<compile_context>
chip_gen: v7x
topology: tpu7x:2x2x1
jax: 0.10.0
libtpu: 0.0.40
codegen_flags: <defaults>
</compile_context>

<pallas_src>
import math
import functools

import jax
import jax.numpy as jnp
from jax.experimental import pallas as pl
from jax.experimental.pallas import tpu as pltpu


def _attn_kernel(q_ref, k_ref, v_ref, vres_ref,
                 wqT_ref, bq_ref, wkT_ref, bk_ref, wvT_ref, bv_ref,
                 woT_ref, bo_ref, gamma_ref, beta_ref,
                 out_ref, *, nhead, d_real, e_real, eps):
    # Block shapes:
    #   q/k/v:   (Bt, H, S, Dp)   head-padded activations (pad cols are zero)
    #   vres:    (Bt, S, Ep)      original mV, E padded to Ep (for residual)
    #   wqT/...: (Dp, Dp)         pre-transposed, zero-padded weights
    #   woT:     (H, Dp, Ep)      per-head slice of Wo^T, zero-padded
    #   out:     (Bt, S, Ep)
    bt, nh, s, dp = q_ref.shape
    ep = out_ref.shape[-1]
    n = bt * nh

    def project(x_ref, wT_ref, b_ref):
        # One packed matmul for all heads (and all batch rows in this block):
        # (Bt*H*S, Dp) @ (Dp, Dp). Zero padding keeps pad columns exactly zero.
        x = x_ref[...].reshape(n * s, dp)
        y = jnp.dot(x, wT_ref[...], preferred_element_type=jnp.float32) + b_ref[...]
        return y.reshape(n, s, dp)

    qp = project(q_ref, wqT_ref, bq_ref)   # (n, S, Dp)
    kp = project(k_ref, wkT_ref, bk_ref)
    vp = project(v_ref, wvT_ref, bv_ref)

    # Scaled dot-product attention, batched over (batch, head).
    # Contract the last dims directly -- no in-kernel transpose of K.
    inv_sqrt_d = 1.0 / math.sqrt(d_real)
    scores = jnp.einsum("nqd,nkd->nqk", qp, kp,
                        preferred_element_type=jnp.float32) * inv_sqrt_d
    scores = scores - jnp.max(scores, axis=-1, keepdims=True)
    p = jnp.exp(scores)
    p = p * pl.reciprocal(jnp.sum(p, axis=-1, keepdims=True), approx=True)
    attn = jnp.einsum("nqk,nkd->nqd", p, vp,
                      preferred_element_type=jnp.float32)      # (n, S, Dp)

    # Output projection: fold the head concat into the matmul by accumulating
    # head_out_h @ WoT_slice_h.  Each iteration is a lane-dense
    # (Bt*S, 128) @ (128, 128) MXU matmul; no concatenate, no slicing at
    # non-128 offsets.
    attn = attn.reshape(bt, nh, s, dp)
    acc = jnp.zeros((bt * s, ep), jnp.float32)
    for h in range(nhead):                                     # static, small
        acc = acc + jnp.dot(attn[:, h].reshape(bt * s, dp), woT_ref[h],
                            preferred_element_type=jnp.float32)
    out = acc + bo_ref[...]

    # Residual + LayerNorm over the REAL e_real features.
    # Pad columns of `out` and `vres` are exactly zero, so the plain sum over
    # Ep divided by e_real gives the correct mean; variance uses a feature mask.
    resid = out + vres_ref[...].reshape(bt * s, ep)
    col = jax.lax.broadcasted_iota(jnp.int32, (1, ep), 1)
    feat_mask = (col < e_real).astype(jnp.float32)
    inv_e = 1.0 / e_real
    mean = jnp.sum(resid, axis=-1, keepdims=True) * inv_e
    centered = (resid - mean) * feat_mask
    var = jnp.sum(centered * centered, axis=-1, keepdims=True) * inv_e
    normed = centered * jax.lax.rsqrt(var + eps)
    y = normed * gamma_ref[...] + beta_ref[...]
    out_ref[...] = y.reshape(bt, s, ep).astype(out_ref.dtype)


def attention_layer(mQ, mK, mV, params, *, nhead, eps=1e-5, block_b=1):
    B, S, E = mK.shape
    D = E // nhead
    Dp = pl.cdiv(D, 128) * 128          # lane-dense padded head dim
    Ep = pl.cdiv(E, 128) * 128          # lane-dense padded embedding dim
    dtype = mQ.dtype

    assert B % block_b == 0, "block_b must divide the batch size"

    # ---- host-side layout plumbing (free; no in-kernel relayouts) ----------
    def to_heads(x):                    # (B,S,E) -> (B,H,S,Dp), zero-padded
        xh = x.reshape(B, S, nhead, D).transpose(0, 2, 1, 3)
        return jnp.pad(xh, ((0, 0), (0, 0), (0, 0), (0, Dp - D)))

    qh, kh, vh = to_heads(mQ), to_heads(mK), to_heads(mV)
    v_res = jnp.pad(mV, ((0, 0), (0, 0), (0, Ep - E)))          # for residual

    def pad_wT(w):                      # torch (out,in) -> transposed + padded
        return jnp.pad(w.T, ((0, Dp - D), (0, Dp - D))).astype(dtype)

    def pad_vec(b, pad_to):
        b = b.reshape(1, -1)
        return jnp.pad(b, ((0, 0), (0, pad_to - b.shape[1]))).astype(dtype)

    wqT = pad_wT(params["wq"]); bq = pad_vec(params["bq"], Dp)
    wkT = pad_wT(params["wk"]); bk = pad_vec(params["bk"], Dp)
    wvT = pad_wT(params["wv"]); bv = pad_vec(params["bv"], Dp)

    # Wo^T split per head (rows h*D:(h+1)*D), zero-padded to (H, Dp, Ep).
    woT = params["wo"].T.reshape(nhead, D, E)
    woT_h = jnp.zeros((nhead, Dp, Ep), dtype).at[:, :D, :E].set(woT)
    bo = pad_vec(params["bo"], Ep)
    gamma = pad_vec(params["gamma"], Ep)
    beta = pad_vec(params["beta"], Ep)

    kernel = functools.partial(_attn_kernel, nhead=nhead,
                               d_real=D, e_real=E, eps=eps)

    Bt = block_b
    grid = (B // Bt,)                   # >=2 steps keeps v7x megacore happy

    act_head_spec = pl.BlockSpec((Bt, nhead, S, Dp), lambda b: (b, 0, 0, 0))
    act_spec = pl.BlockSpec((Bt, S, Ep), lambda b: (b, 0, 0))
    w_dd = pl.BlockSpec((Dp, Dp), lambda b: (0, 0))
    vec_d = pl.BlockSpec((1, Dp), lambda b: (0, 0))
    wo_spec = pl.BlockSpec((nhead, Dp, Ep), lambda b: (0, 0, 0))
    vec_e = pl.BlockSpec((1, Ep), lambda b: (0, 0))

    out_padded = pl.pallas_call(
        kernel,
        out_shape=jax.ShapeDtypeStruct((B, S, Ep), dtype),
        grid=grid,
        in_specs=[act_head_spec, act_head_spec, act_head_spec, act_spec,
                  w_dd, vec_d, w_dd, vec_d, w_dd, vec_d,
                  wo_spec, vec_e, vec_e, vec_e],
        out_specs=act_spec,
        compiler_params=pltpu.CompilerParams(
            dimension_semantics=("parallel",)),
    )(qh, kh, vh, v_res,
      wqT, bq, wkT, bk, wvT, bv,
      woT_h, bo, gamma, beta)

    return out_padded[:, :, :E]


def reference(mQ, mK, mV, params, *, nhead, eps=1e-5):
    """Pure-JAX reference mirroring the PyTorch forward."""
    B, S, E = mK.shape
    D = E // nhead

    def lin(x, w, b):  # x: (..., D_in), w: (D_out, D_in)
        return jnp.einsum("...i,oi->...o", x, w) + b[0]

    q = lin(mQ.reshape(B, S, nhead, D), params["wq"], params["bq"]).transpose(0, 2, 1, 3)
    k = lin(mK.reshape(B, S, nhead, D), params["wk"], params["bk"]).transpose(0, 2, 1, 3)
    v = lin(mV.reshape(B, S, nhead, D), params["wv"], params["bv"]).transpose(0, 2, 1, 3)
    prod = jnp.einsum("bhqd,bhkd->bhqk", q, k) / math.sqrt(D)
    sc = jax.nn.softmax(prod, axis=-1)
    out = jnp.einsum("bhqk,bhkd->bhqd", sc, v).transpose(0, 2, 1, 3).reshape(B, S, E)
    out = lin(out, params["wo"], params["bo"])
    resid = out + mV
    mean = jnp.mean(resid, axis=-1, keepdims=True)
    var = jnp.mean((resid - mean) ** 2, axis=-1, keepdims=True)
    return (resid - mean) / jnp.sqrt(var + eps) * params["gamma"][0] + params["beta"][0]


if __name__ == "__main__":
    # small but module-consistent shapes: E=100, nhead=5 -> emb_head=20
    B, S, E, H = 2, 8, 100, 5
    D = E // H

    key = jax.random.PRNGKey(0)
    ks = jax.random.split(key, 12)

    params = {
        "wq": jax.random.normal(ks[0], (D, D), jnp.float32),
        "bq": 0.01 * jax.random.normal(ks[1], (1, D), jnp.float32),
        "wk": jax.random.normal(ks[2], (D, D), jnp.float32),
        "bk": 0.01 * jax.random.normal(ks[3], (1, D), jnp.float32),
        "wv": jax.random.normal(ks[4], (D, D), jnp.float32),
        "bv": 0.01 * jax.random.normal(ks[5], (1, D), jnp.float32),
        "wo": jax.random.normal(ks[6], (E, E), jnp.float32),
        "bo": 0.01 * jax.random.normal(ks[7], (1, E), jnp.float32),
        "gamma": jnp.ones((1, E), jnp.float32),   # nn.LayerNorm default
        "beta": jnp.zeros((1, E), jnp.float32),
    }

    mQ = jax.random.normal(ks[8], (B, S, E), jnp.float32)
    mK = jax.random.normal(ks[9], (B, S, E), jnp.float32)
    mV = jax.random.normal(ks[10], (B, S, E), jnp.float32)

    out = attention_layer(mQ, mK, mV, params, nhead=H, block_b=1)
    out = jax.block_until_ready(out)

    ref = reference(mQ, mK, mV, params, nhead=H)
    assert out.shape == (B, S, E)
    max_err = float(jnp.max(jnp.abs(out - ref)))
    # approx=True softmax reciprocal (EUP vrcp) introduces a tiny relative error
    assert jnp.allclose(out, ref, atol=5e-3, rtol=5e-3), \
        f"mismatch vs reference (max abs err {max_err})"

    print("KERNEL_OK")
</pallas_src>

<mosaic_0001>
module attributes {stable_mosaic.version = 11 : i64} {
  func.func @_attn_kernel(%arg0: i32, %arg1: memref<1x5x8x128xf32, #tpu.memory_space<vmem>>, %arg2: memref<1x5x8x128xf32, #tpu.memory_space<vmem>>, %arg3: memref<1x5x8x128xf32, #tpu.memory_space<vmem>>, %arg4: memref<1x8x128xf32, #tpu.memory_space<vmem>>, %arg5: memref<128x128xf32, #tpu.memory_space<vmem>>, %arg6: memref<1x128xf32, #tpu.memory_space<vmem>>, %arg7: memref<128x128xf32, #tpu.memory_space<vmem>>, %arg8: memref<1x128xf32, #tpu.memory_space<vmem>>, %arg9: memref<128x128xf32, #tpu.memory_space<vmem>>, %arg10: memref<1x128xf32, #tpu.memory_space<vmem>>, %arg11: memref<5x128x128xf32, #tpu.memory_space<vmem>>, %arg12: memref<1x128xf32, #tpu.memory_space<vmem>>, %arg13: memref<1x128xf32, #tpu.memory_space<vmem>>, %arg14: memref<1x128xf32, #tpu.memory_space<vmem>>, %arg15: memref<1x8x128xf32, #tpu.memory_space<vmem>>) attributes {dimension_semantics = [#tpu.dimension_semantics<parallel>], iteration_bounds = array<i64: 2>, scalar_prefetch = 0 : i64, scratch_operands = 0 : i64, tpu.core_type = #tpu.core_type<tc>, window_params = [{transform_indices = @transform_0, window_bounds = array<i64: 1, 5, 8, 128>}, {transform_indices = @transform_1, window_bounds = array<i64: 1, 5, 8, 128>}, {transform_indices = @transform_2, window_bounds = array<i64: 1, 5, 8, 128>}, {transform_indices = @transform_3, window_bounds = array<i64: 1, 8, 128>}, {pipeline_mode = #tpu.pipeline_mode<synchronous>, transform_indices = @transform_4, window_bounds = array<i64: 128, 128>}, {pipeline_mode = #tpu.pipeline_mode<synchronous>, transform_indices = @transform_5, window_bounds = array<i64: 1, 128>}, {pipeline_mode = #tpu.pipeline_mode<synchronous>, transform_indices = @transform_6, window_bounds = array<i64: 128, 128>}, {pipeline_mode = #tpu.pipeline_mode<synchronous>, transform_indices = @transform_7, window_bounds = array<i64: 1, 128>}, {pipeline_mode = #tpu.pipeline_mode<synchronous>, transform_indices = @transform_8, window_bounds = array<i64: 128, 128>}, {pipeline_mode = #tpu.pipeline_mode<synchronous>, transform_indices = @transform_9, window_bounds = array<i64: 1, 128>}, {pipeline_mode = #tpu.pipeline_mode<synchronous>, transform_indices = @transform_10, window_bounds = array<i64: 5, 128, 128>}, {pipeline_mode = #tpu.pipeline_mode<synchronous>, transform_indices = @transform_11, window_bounds = array<i64: 1, 128>}, {pipeline_mode = #tpu.pipeline_mode<synchronous>, transform_indices = @transform_12, window_bounds = array<i64: 1, 128>}, {pipeline_mode = #tpu.pipeline_mode<synchronous>, transform_indices = @transform_13, window_bounds = array<i64: 1, 128>}, {transform_indices = @transform_14, window_bounds = array<i64: 1, 8, 128>}]} {
    %c0 = arith.constant 0 : index
    %c0_0 = arith.constant 0 : index
    %c0_1 = arith.constant 0 : index
    %c0_2 = arith.constant 0 : index
    %0 = vector.load %arg1[%c0, %c0_0, %c0_1, %c0_2] : memref<1x5x8x128xf32, #tpu.memory_space<vmem>>, vector<1x5x8x128xf32>
    %1 = vector.shape_cast %0 : vector<1x5x8x128xf32> to vector<40x128xf32>
    %c0_3 = arith.constant 0 : index
    %c0_4 = arith.constant 0 : index
    %2 = vector.load %arg5[%c0_3, %c0_4] : memref<128x128xf32, #tpu.memory_space<vmem>>, vector<128x128xf32>
    %cst = arith.constant dense<0.000000e+00> : vector<40x128xf32>
    %3 = tpu.matmul %1, %2, %cst {dimension_numbers = #tpu.dot_dimension_numbers<[1], [0], [0], [1], [0, 0, 1, 1], [], []>} : vector<40x128xf32>, vector<128x128xf32>, vector<40x128xf32> -> vector<40x128xf32>
    %c0_5 = arith.constant 0 : index
    %c0_6 = arith.constant 0 : index
    %4 = vector.load %arg6[%c0_5, %c0_6] : memref<1x128xf32, #tpu.memory_space<vmem>>, vector<1x128xf32>
    %5 = vector.broadcast %4 : vector<1x128xf32> to vector<40x128xf32>
    %6 = arith.addf %3, %5 : vector<40x128xf32>
    %7 = vector.shape_cast %6 : vector<40x128xf32> to vector<5x8x128xf32>
    %c0_7 = arith.constant 0 : index
    %c0_8 = arith.constant 0 : index
    %c0_9 = arith.constant 0 : index
    %c0_10 = arith.constant 0 : index
    %8 = vector.load %arg2[%c0_7, %c0_8, %c0_9, %c0_10] : memref<1x5x8x128xf32, #tpu.memory_space<vmem>>, vector<1x5x8x128xf32>
    %9 = vector.shape_cast %8 : vector<1x5x8x128xf32> to vector<40x128xf32>
    %c0_11 = arith.constant 0 : index
    %c0_12 = arith.constant 0 : index
    %10 = vector.load %arg7[%c0_11, %c0_12] : memref<128x128xf32, #tpu.memory_space<vmem>>, vector<128x128xf32>
    %cst_13 = arith.constant dense<0.000000e+00> : vector<40x128xf32>
    %11 = tpu.matmul %9, %10, %cst_13 {dimension_numbers = #tpu.dot_dimension_numbers<[1], [0], [0], [1], [0, 0, 1, 1], [], []>} : vector<40x128xf32>, vector<128x128xf32>, vector<40x128xf32> -> vector<40x128xf32>
    %c0_14 = arith.constant 0 : index
    %c0_15 = arith.constant 0 : index
    %12 = vector.load %arg8[%c0_14, %c0_15] : memref<1x128xf32, #tpu.memory_space<vmem>>, vector<1x128xf32>
    %13 = vector.broadcast %12 : vector<1x128xf32> to vector<40x128xf32>
    %14 = arith.addf %11, %13 : vector<40x128xf32>
    %15 = vector.shape_cast %14 : vector<40x128xf32> to vector<5x8x128xf32>
    %c0_16 = arith.constant 0 : index
    %c0_17 = arith.constant 0 : index
    %c0_18 = arith.constant 0 : index
    %c0_19 = arith.constant 0 : index
    %16 = vector.load %arg3[%c0_16, %c0_17, %c0_18, %c0_19] : memref<1x5x8x128xf32, #tpu.memory_space<vmem>>, vector<1x5x8x128xf32>
    %17 = vector.shape_cast %16 : vector<1x5x8x128xf32> to vector<40x128xf32>
    %c0_20 = arith.constant 0 : index
    %c0_21 = arith.constant 0 : index
    %18 = vector.load %arg9[%c0_20, %c0_21] : memref<128x128xf32, #tpu.memory_space<vmem>>, vector<128x128xf32>
    %cst_22 = arith.constant dense<0.000000e+00> : vector<40x128xf32>
    %19 = tpu.matmul %17, %18, %cst_22 {dimension_numbers = #tpu.dot_dimension_numbers<[1], [0], [0], [1], [0, 0, 1, 1], [], []>} : vector<40x128xf32>, vector<128x128xf32>, vector<40x128xf32> -> vector<40x128xf32>
    %c0_23 = arith.constant 0 : index
    %c0_24 = arith.constant 0 : index
    %20 = vector.load %arg10[%c0_23, %c0_24] : memref<1x128xf32, #tpu.memory_space<vmem>>, vector<1x128xf32>
    %21 = vector.broadcast %20 : vector<1x128xf32> to vector<40x128xf32>
    %22 = arith.addf %19, %21 : vector<40x128xf32>
    %23 = vector.shape_cast %22 : vector<40x128xf32> to vector<5x8x128xf32>
    "tpu.trace_start"() <{level = 10 : i32, message = "nqd,nkd->nqk"}> : () -> ()
    %cst_25 = arith.constant dense<0.000000e+00> : vector<5x8x8xf32>
    %24 = tpu.matmul %7, %15, %cst_25 {dimension_numbers = #tpu.dot_dimension_numbers<[2], [2], [1], [1], [0, 0, 0, 1, 1, 1], [0], [0]>} : vector<5x8x128xf32>, vector<5x8x128xf32>, vector<5x8x8xf32> -> vector<5x8x8xf32>
    "tpu.trace_stop"() : () -> ()
    %cst_26 = arith.constant 0.223606795 : f32
    %25 = vector.broadcast %cst_26 : f32 to vector<5x8x8xf32>
    %26 = arith.mulf %24, %25 : vector<5x8x8xf32>
    %cst_27 = arith.constant dense<0xFF800000> : vector<5x8xf32>
    %27 = vector.multi_reduction <maximumf>, %26, %cst_27 [2] : vector<5x8x8xf32> to vector<5x8xf32>
    %28 = vector.shape_cast %27 : vector<5x8xf32> to vector<5x8x1xf32>
    %29 = vector.broadcast %28 : vector<5x8x1xf32> to vector<5x8x8xf32>
    %30 = arith.subf %26, %29 : vector<5x8x8xf32>
    %31 = math.exp %30 : vector<5x8x8xf32>
    %cst_28 = arith.constant dense<0.000000e+00> : vector<5x8xf32>
    %32 = vector.multi_reduction <add>, %31, %cst_28 [2] : vector<5x8x8xf32> to vector<5x8xf32>
    %33 = vector.shape_cast %32 : vector<5x8xf32> to vector<5x8x1xf32>
    %34 = tpu.reciprocal %33 {approx = true} : vector<5x8x1xf32> -> vector<5x8x1xf32>
    %35 = vector.broadcast %34 : vector<5x8x1xf32> to vector<5x8x8xf32>
    %36 = arith.mulf %31, %35 : vector<5x8x8xf32>
    "tpu.trace_start"() <{level = 10 : i32, message = "nqk,nkd->nqd"}> : () -> ()
    %cst_29 = arith.constant dense<0.000000e+00> : vector<5x8x128xf32>
    %37 = tpu.matmul %36, %23, %cst_29 {dimension_numbers = #tpu.dot_dimension_numbers<[2], [1], [1], [2], [0, 0, 0, 1, 1, 2], [0], [0]>} : vector<5x8x8xf32>, vector<5x8x128xf32>, vector<5x8x128xf32> -> vector<5x8x128xf32>
    "tpu.trace_stop"() : () -> ()
    %38 = vector.shape_cast %37 : vector<5x8x128xf32> to vector<1x5x8x128xf32>
    %cst_30 = arith.constant 0.000000e+00 : f32
    %39 = vector.broadcast %cst_30 : f32 to vector<8x128xf32>
    %40 = vector.extract_strided_slice %38 {offsets = [0, 0, 0, 0], sizes = [1, 1, 8, 128], strides = [1, 1, 1, 1]} : vector<1x5x8x128xf32> to vector<1x1x8x128xf32>
    %41 = vector.shape_cast %40 : vector<1x1x8x128xf32> to vector<1x8x128xf32>
    %42 = vector.shape_cast %41 : vector<1x8x128xf32> to vector<8x128xf32>
    %c0_31 = arith.constant 0 : index
    %c0_32 = arith.constant 0 : index
    %c0_33 = arith.constant 0 : index
    %43 = vector.load %arg11[%c0_31, %c0_32, %c0_33] : memref<5x128x128xf32, #tpu.memory_space<vmem>>, vector<1x128x128xf32>
    %44 = vector.shape_cast %43 : vector<1x128x128xf32> to vector<128x128xf32>
    %cst_34 = arith.constant dense<0.000000e+00> : vector<8x128xf32>
    %45 = tpu.matmul %42, %44, %cst_34 {dimension_numbers = #tpu.dot_dimension_numbers<[1], [0], [0], [1], [0, 0, 1, 1], [], []>} : vector<8x128xf32>, vector<128x128xf32>, vector<8x128xf32> -> vector<8x128xf32>
    %46 = arith.addf %39, %45 : vector<8x128xf32>
    %47 = vector.extract_strided_slice %38 {offsets = [0, 1, 0, 0], sizes = [1, 1, 8, 128], strides = [1, 1, 1, 1]} : vector<1x5x8x128xf32> to vector<1x1x8x128xf32>
    %48 = vector.shape_cast %47 : vector<1x1x8x128xf32> to vector<1x8x128xf32>
    %49 = vector.shape_cast %48 : vector<1x8x128xf32> to vector<8x128xf32>
    %c1 = arith.constant 1 : index
    %c0_35 = arith.constant 0 : index
    %c0_36 = arith.constant 0 : index
    %50 = vector.load %arg11[%c1, %c0_35, %c0_36] : memref<5x128x128xf32, #tpu.memory_space<vmem>>, vector<1x128x128xf32>
    %51 = vector.shape_cast %50 : vector<1x128x128xf32> to vector<128x128xf32>
    %cst_37 = arith.constant dense<0.000000e+00> : vector<8x128xf32>
    %52 = tpu.matmul %49, %51, %cst_37 {dimension_numbers = #tpu.dot_dimension_numbers<[1], [0], [0], [1], [0, 0, 1, 1], [], []>} : vector<8x128xf32>, vector<128x128xf32>, vector<8x128xf32> -> vector<8x128xf32>
    %53 = arith.addf %46, %52 : vector<8x128xf32>
    %54 = vector.extract_strided_slice %38 {offsets = [0, 2, 0, 0], sizes = [1, 1, 8, 128], strides = [1, 1, 1, 1]} : vector<1x5x8x128xf32> to vector<1x1x8x128xf32>
    %55 = vector.shape_cast %54 : vector<1x1x8x128xf32> to vector<1x8x128xf32>
    %56 = vector.shape_cast %55 : vector<1x8x128xf32> to vector<8x128xf32>
    %c2 = arith.constant 2 : index
    %c0_38 = arith.constant 0 : index
    %c0_39 = arith.constant 0 : index
    %57 = vector.load %arg11[%c2, %c0_38, %c0_39] : memref<5x128x128xf32, #tpu.memory_space<vmem>>, vector<1x128x128xf32>
    %58 = vector.shape_cast %57 : vector<1x128x128xf32> to vector<128x128xf32>
    %cst_40 = arith.constant dense<0.000000e+00> : vector<8x128xf32>
    %59 = tpu.matmul %56, %58, %cst_40 {dimension_numbers = #tpu.dot_dimension_numbers<[1], [0], [0], [1], [0, 0, 1, 1], [], []>} : vector<8x128xf32>, vector<128x128xf32>, vector<8x128xf32> -> vector<8x128xf32>
    %60 = arith.addf %53, %59 : vector<8x128xf32>
    %61 = vector.extract_strided_slice %38 {offsets = [0, 3, 0, 0], sizes = [1, 1, 8, 128], strides = [1, 1, 1, 1]} : vector<1x5x8x128xf32> to vector<1x1x8x128xf32>
    %62 = vector.shape_cast %61 : vector<1x1x8x128xf32> to vector<1x8x128xf32>
    %63 = vector.shape_cast %62 : vector<1x8x128xf32> to vector<8x128xf32>
    %c3 = arith.constant 3 : index
    %c0_41 = arith.constant 0 : index
    %c0_42 = arith.constant 0 : index
    %64 = vector.load %arg11[%c3, %c0_41, %c0_42] : memref<5x128x128xf32, #tpu.memory_space<vmem>>, vector<1x128x128xf32>
    %65 = vector.shape_cast %64 : vector<1x128x128xf32> to vector<128x128xf32>
    %cst_43 = arith.constant dense<0.000000e+00> : vector<8x128xf32>
    %66 = tpu.matmul %63, %65, %cst_43 {dimension_numbers = #tpu.dot_dimension_numbers<[1], [0], [0], [1], [0, 0, 1, 1], [], []>} : vector<8x128xf32>, vector<128x128xf32>, vector<8x128xf32> -> vector<8x128xf32>
    %67 = arith.addf %60, %66 : vector<8x128xf32>
    %68 = vector.extract_strided_slice %38 {offsets = [0, 4, 0, 0], sizes = [1, 1, 8, 128], strides = [1, 1, 1, 1]} : vector<1x5x8x128xf32> to vector<1x1x8x128xf32>
    %69 = vector.shape_cast %68 : vector<1x1x8x128xf32> to vector<1x8x128xf32>
    %70 = vector.shape_cast %69 : vector<1x8x128xf32> to vector<8x128xf32>
    %c4 = arith.constant 4 : index
    %c0_44 = arith.constant 0 : index
    %c0_45 = arith.constant 0 : index
    %71 = vector.load %arg11[%c4, %c0_44, %c0_45] : memref<5x128x128xf32, #tpu.memory_space<vmem>>, vector<1x128x128xf32>
    %72 = vector.shape_cast %71 : vector<1x128x128xf32> to vector<128x128xf32>
    %cst_46 = arith.constant dense<0.000000e+00> : vector<8x128xf32>
    %73 = tpu.matmul %70, %72, %cst_46 {dimension_numbers = #tpu.dot_dimension_numbers<[1], [0], [0], [1], [0, 0, 1, 1], [], []>} : vector<8x128xf32>, vector<128x128xf32>, vector<8x128xf32> -> vector<8x128xf32>
    %74 = arith.addf %67, %73 : vector<8x128xf32>
    %c0_47 = arith.constant 0 : index
    %c0_48 = arith.constant 0 : index
    %75 = vector.load %arg12[%c0_47, %c0_48] : memref<1x128xf32, #tpu.memory_space<vmem>>, vector<1x128xf32>
    %76 = vector.broadcast %75 : vector<1x128xf32> to vector<8x128xf32>
    %77 = arith.addf %74, %76 : vector<8x128xf32>
    %c0_49 = arith.constant 0 : index
    %c0_50 = arith.constant 0 : index
    %c0_51 = arith.constant 0 : index
    %78 = vector.load %arg4[%c0_49, %c0_50, %c0_51] : memref<1x8x128xf32, #tpu.memory_space<vmem>>, vector<1x8x128xf32>
    %79 = vector.shape_cast %78 : vector<1x8x128xf32> to vector<8x128xf32>
    %80 = arith.addf %77, %79 : vector<8x128xf32>
    %81 = tpu.iota {dimensions = array<i32: 1>} : vector<1x128xi32>
    %c100_i32 = arith.constant 100 : i32
    %82 = vector.broadcast %c100_i32 : i32 to vector<1x128xi32>
    %83 = arith.cmpi slt, %81, %82 : vector<1x128xi32>
    %84 = arith.extui %83 : vector<1x128xi1> to vector<1x128xi32>
    %85 = arith.sitofp %84 : vector<1x128xi32> to vector<1x128xf32>
    %cst_52 = arith.constant dense<0.000000e+00> : vector<8xf32>
    %86 = vector.multi_reduction <add>, %80, %cst_52 [1] : vector<8x128xf32> to vector<8xf32>
    %87 = vector.shape_cast %86 : vector<8xf32> to vector<8x1xf32>
    %cst_53 = arith.constant 0.00999999977 : f32
    %88 = vector.broadcast %cst_53 : f32 to vector<8x1xf32>
    %89 = arith.mulf %87, %88 : vector<8x1xf32>
    %90 = vector.broadcast %89 : vector<8x1xf32> to vector<8x128xf32>
    %91 = arith.subf %80, %90 : vector<8x128xf32>
    %92 = vector.broadcast %85 : vector<1x128xf32> to vector<8x128xf32>
    %93 = arith.mulf %91, %92 : vector<8x128xf32>
    %94 = arith.mulf %93, %93 : vector<8x128xf32>
    %cst_54 = arith.constant dense<0.000000e+00> : vector<8xf32>
    %95 = vector.multi_reduction <add>, %94, %cst_54 [1] : vector<8x128xf32> to vector<8xf32>
    %96 = vector.shape_cast %95 : vector<8xf32> to vector<8x1xf32>
    %cst_55 = arith.constant 0.00999999977 : f32
    %97 = vector.broadcast %cst_55 : f32 to vector<8x1xf32>
    %98 = arith.mulf %96, %97 : vector<8x1xf32>
    %cst_56 = arith.constant 9.99999974E-6 : f32
    %99 = vector.broadcast %cst_56 : f32 to vector<8x1xf32>
    %100 = arith.addf %98, %99 : vector<8x1xf32>
    %101 = math.rsqrt %100 : vector<8x1xf32>
    %102 = vector.broadcast %101 : vector<8x1xf32> to vector<8x128xf32>
    %103 = arith.mulf %93, %102 : vector<8x128xf32>
    %c0_57 = arith.constant 0 : index
    %c0_58 = arith.constant 0 : index
    %104 = vector.load %arg13[%c0_57, %c0_58] : memref<1x128xf32, #tpu.memory_space<vmem>>, vector<1x128xf32>
    %105 = vector.broadcast %104 : vector<1x128xf32> to vector<8x128xf32>
    %106 = arith.mulf %103, %105 : vector<8x128xf32>
    %c0_59 = arith.constant 0 : index
    %c0_60 = arith.constant 0 : index
    %107 = vector.load %arg14[%c0_59, %c0_60] : memref<1x128xf32, #tpu.memory_space<vmem>>, vector<1x128xf32>
    %108 = vector.broadcast %107 : vector<1x128xf32> to vector<8x128xf32>
    %109 = arith.addf %106, %108 : vector<8x128xf32>
    %110 = vector.shape_cast %109 : vector<8x128xf32> to vector<1x8x128xf32>
    %c0_61 = arith.constant 0 : index
    %c0_62 = arith.constant 0 : index
    %c0_63 = arith.constant 0 : index
    %111 = vector.load %arg15[%c0_61, %c0_62, %c0_63] : memref<1x8x128xf32, #tpu.memory_space<vmem>>, vector<1x8x128xf32>
    tpu.vector_store %arg15[%c0_61, %c0_62, %c0_63], %110 {strides = array<i32>} : memref<1x8x128xf32, #tpu.memory_space<vmem>>, vector<1x8x128xf32>,
    return
  }
  func.func @transform_0(%arg0: i32) -> (i32, i32, i32, i32) {
    %c0_i32 = arith.constant 0 : i32
    %c0_i32_0 = arith.constant 0 : i32
    %c0_i32_1 = arith.constant 0 : i32
    %c0_i32_2 = arith.constant 0 : i32
    return %arg0, %c0_i32, %c0_i32_0, %c0_i32_1 : i32, i32, i32, i32
  }
  func.func @transform_1(%arg0: i32) -> (i32, i32, i32, i32) {
    %c0_i32 = arith.constant 0 : i32
    %c0_i32_0 = arith.constant 0 : i32
    %c0_i32_1 = arith.constant 0 : i32
    %c0_i32_2 = arith.constant 0 : i32
    return %arg0, %c0_i32, %c0_i32_0, %c0_i32_1 : i32, i32, i32, i32
  }
  func.func @transform_2(%arg0: i32) -> (i32, i32, i32, i32) {
    %c0_i32 = arith.constant 0 : i32
    %c0_i32_0 = arith.constant 0 : i32
    %c0_i32_1 = arith.constant 0 : i32
    %c0_i32_2 = arith.constant 0 : i32
    return %arg0, %c0_i32, %c0_i32_0, %c0_i32_1 : i32, i32, i32, i32
  }
  func.func @transform_3(%arg0: i32) -> (i32, i32, i32) {
    %c0_i32 = arith.constant 0 : i32
    %c0_i32_0 = arith.constant 0 : i32
    %c0_i32_1 = arith.constant 0 : i32
    return %arg0, %c0_i32, %c0_i32_0 : i32, i32, i32
  }
  func.func @transform_4(%arg0: i32) -> (i32, i32) {
    %c0_i32 = arith.constant 0 : i32
    %c0_i32_0 = arith.constant 0 : i32
    %c0_i32_1 = arith.constant 0 : i32
    return %c0_i32, %c0_i32_0 : i32, i32
  }
  func.func @transform_5(%arg0: i32) -> (i32, i32) {
    %c0_i32 = arith.constant 0 : i32
    %c0_i32_0 = arith.constant 0 : i32
    %c0_i32_1 = arith.constant 0 : i32
    return %c0_i32, %c0_i32_0 : i32, i32
  }
  func.func @transform_6(%arg0: i32) -> (i32, i32) {
    %c0_i32 = arith.constant 0 : i32
    %c0_i32_0 = arith.constant 0 : i32
    %c0_i32_1 = arith.constant 0 : i32
    return %c0_i32, %c0_i32_0 : i32, i32
  }
  func.func @transform_7(%arg0: i32) -> (i32, i32) {
    %c0_i32 = arith.constant 0 : i32
    %c0_i32_0 = arith.constant 0 : i32
    %c0_i32_1 = arith.constant 0 : i32
    return %c0_i32, %c0_i32_0 : i32, i32
  }
  func.func @transform_8(%arg0: i32) -> (i32, i32) {
    %c0_i32 = arith.constant 0 : i32
    %c0_i32_0 = arith.constant 0 : i32
    %c0_i32_1 = arith.constant 0 : i32
    return %c0_i32, %c0_i32_0 : i32, i32
  }
  func.func @transform_9(%arg0: i32) -> (i32, i32) {
    %c0_i32 = arith.constant 0 : i32
    %c0_i32_0 = arith.constant 0 : i32
    %c0_i32_1 = arith.constant 0 : i32
    return %c0_i32, %c0_i32_0 : i32, i32
  }
  func.func @transform_10(%arg0: i32) -> (i32, i32, i32) {
    %c0_i32 = arith.constant 0 : i32
    %c0_i32_0 = arith.constant 0 : i32
    %c0_i32_1 = arith.constant 0 : i32
    %c0_i32_2 = arith.constant 0 : i32
    return %c0_i32, %c0_i32_0, %c0_i32_1 : i32, i32, i32
  }
  func.func @transform_11(%arg0: i32) -> (i32, i32) {
    %c0_i32 = arith.constant 0 : i32
    %c0_i32_0 = arith.constant 0 : i32
    %c0_i32_1 = arith.constant 0 : i32
    return %c0_i32, %c0_i32_0 : i32, i32
  }
  func.func @transform_12(%arg0: i32) -> (i32, i32) {
    %c0_i32 = arith.constant 0 : i32
    %c0_i32_0 = arith.constant 0 : i32
    %c0_i32_1 = arith.constant 0 : i32
    return %c0_i32, %c0_i32_0 : i32, i32
  }
  func.func @transform_13(%arg0: i32) -> (i32, i32) {
    %c0_i32 = arith.constant 0 : i32
    %c0_i32_0 = arith.constant 0 : i32
    %c0_i32_1 = arith.constant 0 : i32
    return %c0_i32, %c0_i32_0 : i32, i32
  }
  func.func @transform_14(%arg0: i32) -> (i32, i32, i32) {
    %c0_i32 = arith.constant 0 : i32
    %c0_i32_0 = arith.constant 0 : i32
    %c0_i32_1 = arith.constant 0 : i32
    return %arg0, %c0_i32, %c0_i32_0 : i32, i32, i32
  }
}

</mosaic_0001>

<bundles_post_ra>
// kernel: tpu_custom_call.1
= control target key start
LH: loop header
LB: loop body
LE: loop exit
PB: predicated region body
PF: predicated region fallthrough
CT: control target
= control target key end

     0   :  { %s4405_s0 = inlined_call_operand.hbm [shape: f32[2,5,8,128], index: 0, kind: input, shape index: {}]   ;;  %s4406_s1 = inlined_call_operand.hbm [shape: f32[2,5,8,128], index: 1, kind: input, shape index: {}]   ;;  %s4407_s2 = inlined_call_operand.hbm [shape: f32[2,5,8,128], index: 2, kind: input, shape index: {}]   ;;  %s4408_s3 = inlined_call_operand.hbm [shape: f32[2,8,128], index: 3, kind: input, shape index: {}]   ;;  %s4409_s4 = inlined_call_operand.hbm [shape: f32[128,128], index: 4, kind: input, shape index: {}]   ;;  %s4410_s5 = inlined_call_operand.vmem [shape: f32[1,128], index: 5, kind: input, shape index: {}]   ;;  %s4411_s6 = inlined_call_operand.hbm [shape: f32[128,128], index: 6, kind: input, shape index: {}]   ;;  %s4412_s7 = inlined_call_operand.vmem [shape: f32[1,128], index: 7, kind: input, shape index: {}]   ;;  %s4413_s8 = inlined_call_operand.hbm [shape: f32[128,128], index: 8, kind: input, shape index: {}]   ;;  %s4414_s9 = inlined_call_operand.vmem [shape: f32[1,128], index: 9, kind: input, shape index: {}]   ;;  %s4415_s10 = inlined_call_operand.hbm [shape: f32[5,128,128], index: 10, kind: input, shape index: {}]   ;;  %s4416_s11 = inlined_call_operand.vmem [shape: f32[1,128], index: 11, kind: input, shape index: {}]   ;;  %s4417_s12 = inlined_call_operand.vmem [shape: f32[1,128], index: 12, kind: input, shape index: {}]   ;;  %s4418_s13 = inlined_call_operand.vmem [shape: f32[1,128], index: 13, kind: input, shape index: {}]   ;;  %s4419_s14 = inlined_call_operand.hbm [shape: f32[2,8,128], index: 14, kind: output, shape index: {}]  }
   0x1   :  { %4447 = sst [smem:[#allocation31_spill]] %s4406_s1 }
   0x2   :  { %4448 = sst [smem:[#allocation32_spill]] %s4409_s4 }
   0x3   :  { %4449 = sst [smem:[#allocation33_spill]] %s4410_s5 }
   0x4   :  { %4450 = sst [smem:[#allocation34_spill]] %s4411_s6 }
   0x5   :  { %4451 = sst [smem:[#allocation35_spill]] %s4412_s7 }
   0x6   :  { %4452 = sst [smem:[#allocation36_spill]] %s4414_s9 }
   0x7   :  { %4453 = sst [smem:[#allocation37_spill]] %s4416_s11 }
   0x8   :  { %4454 = sst [smem:[#allocation38_spill]] %s4417_s12 }
   0x9   :  { %4455 = sst [smem:[#allocation39_spill]] %s4418_s13 }
   0xa   :  { %4456 = sst [smem:[#allocation40_spill]] %s4419_s14 }
   0xb   :  { %19 = vsyncpa [#allocation3], 0 }
   0xc   :  { %21 = vsyncpa [#allocation3 + $0x1], 0 }
   0xd   :  { %22 = vsyncpa [#allocation6], 0 }
   0xe   :  { %24 = vsyncpa [#allocation6 + $0x1], 0 }
   0xf   :  { %25 = vsyncpa [#allocation9], 0 }
  0x10   :  { %27 = vsyncpa [#allocation9 + $0x1], 0 }
  0x11   :  { %28 = vsyncpa [#allocation12], 0 }
  0x12   :  { %29 = vsyncpa [#allocation15], 0 }
  0x13   :  { %30 = vsyncpa [#allocation4], 0 }
  0x14   :  { %32 = vsyncpa [#allocation4 + $0x1], 0  ;;  %s3763_s29 = smov 0   ;;  %s3765_s30 = smov 0  }
  0x15   :  { %s3767_s15 = smov 0   ;;  %s3769_s16 = smov 0  }
  0x16 LB: > { %4457 = sst [smem:[#allocation24_spill]] %s3660_s29  ;;  %s3784_s17 = sadd.s32 4294967295, %s3672_s16   ;;  %s3672_s16 = sphi %s3769_s16, %s4507_s16   ;;  %s3668_s15 = sphi %s3767_s15, %s4509_s15   ;;  %s3664_s30 = sphi %s3765_s30, %s4511_s30   ;;  %s3660_s29 = sphi %s3763_s29, %s4510_s29  }
  0x17   : > { %4458 = sst [smem:[#allocation25_spill]] %s3668_s15  ;;  %s2457_s18 = sadd.s32 4294967294, %s3672_s16  }
  0x18   : > { %4459 = sst [smem:[#allocation26_spill]] %s3784_s17  ;;  %p58_p0 = scmp.ne.s32.totalorder %s3664_s30, %s3660_s29 }
  0x19   : > { %p4423_p1 = scmp.eq.s32.totalorder %s3784_s17, 0  ;;  %p376_p3 = scmp.eq.s32.totalorder %s2457_s18, 1 }
  0x1a   : > { %p2458_p5 = scmp.ge.s32.totalorder %s3672_s16, 1  ;;  %p383_p7 = scmp.lt.s32.totalorder %s3672_s16, 3 }
  0x1b   : > { %p3793_p4 = por %p4423_p1, %p58_p0  ;;  %p3798_p6 = por %p376_p3, %p58_p0 }
  0x1c   : > { %p3803_p8 = pnand %p2458_p5, %p383_p7  ;;  %s3674_s22 = smov [#allocation10]  }
  0x1d   : > { %s4460_s19 = scalar_select %p3793_p4, 1, 0 }
  0x1e   : > { %s4461_s20 = scalar_select %p3798_p6, 1, 0 }
  0x1f   : > { %s4463_s21 = scalar_select %p3803_p8, 1, 0 }
  0x20   : > { %4462 = sst [smem:[#allocation27_spill]] %s4461_s20  ;;  %s395_s23 = sshll.u32 %s3674_s22, 4  ;;  %s3807_s23 = int_to_ptr.vmem [resolvable:$true] %s395_s23 }
  0x21   : > { %p3251_p9 = pneg %p3803_p8  ;;  %s3675_s25 = smov [#allocation11]  }
  0x22   : > { %s411_s26 = sshll.u32 %s3675_s25, 4  ;;  %s4465_s4 = sld [smem:[#allocation32_spill]]  ;;  %s3818_s26 = int_to_ptr.vmem [resolvable:$true] %s411_s26 }
  0x23   : > { %p3814_p11 = pnand %p3251_p9, %p4423_p1 }
  0x25   : > { %s4464_s24 = scalar_select %p3814_p11, 1, 0 }
  0x26   : > { %p3828_p13 = pneg %p3814_p11 }
  0x28   : > { %s3354_s18 = scalar_lea.hbm %s4465_s4, 2048 }
  0x29   : > { %p3355_p12 = scmp.ne.s32.totalorder %s4465_s4, %s3354_s18  ;;  %p3361_p5 = scmp.lt.u32.totalorder %s3354_s18, %s4465_s4 }
  0x2a   : > { %s4466_s29 = scalar_select %p3828_p13, 1, 0 }
  0x2b   : > { %p3357_p0 = pnand %p3828_p13, %p3355_p12 }
  0x2d   : > { %p3358_p3 = pneg %p3357_p0 }
  0x2f   : > { %p3363_p7 = pnand %p3361_p5, %p3358_p3 }
  0x31   : > { %3366 = shalt.err (!%p3363_p7)
}
  0x32   : > { %s3367_s20 = scalar_lea.vmem %s3807_s23, 2048  ;;  %p3375_p2 = scmp.lt.s32.totalorder %s3807_s23, %s3807_s23 }
  0x33   : > { %p3368_p9 = scmp.ne.s32.totalorder %s3807_s23, %s3367_s20  ;;  %p3376_p6 = scmp.lt.s32.totalorder %s3367_s20, %s3367_s20 }
  0x35   : > { %p3370_p10 = pnand %p3368_p9, %p3828_p13  ;;  %p3377_p12 = por %p3376_p6, %p3375_p2 }
  0x37   : > { %p3371_p1 = pneg %p3370_p10 }
  0x39   : > { %p3378_p0 = pnand %p3377_p12, %p3371_p1 }
  0x3b   : > { %3381 = shalt.err (!%p3378_p0)
}
  0x3c   : > { %s4424_s27 = smov 128   ;;  %s4426_s14 = smov 8  }
  0x3d   : > { %3254 = dma.hbm_to_vmem [thread:$0]  (!%p3814_p11), %s4465_s4, 2048, %s3807_s23, [#allocation9], %s4424_s27, %s4424_s27, %s4426_s14  }
  0x3e   : > { %s4467_s6 = sld [smem:[#allocation34_spill]] }
  0x44   : > { %s3382_s20 = scalar_lea.hbm %s4467_s6, 2048 }
  0x45   : > { %p3383_p1 = scmp.ne.s32.totalorder %s4467_s6, %s3382_s20  ;;  %p3389_p10 = scmp.lt.u32.totalorder %s3382_s20, %s4467_s6 }
  0x47   : > { %p3385_p2 = pnand %p3383_p1, %p3828_p13 }
  0x49   : > { %p3386_p6 = pneg %p3385_p2 }
  0x4b   : > { %p3391_p3 = pnand %p3389_p10, %p3386_p6 }
  0x4d   : > { %3394 = shalt.err (!%p3391_p3)
}
  0x4e   : > { %s3395_s23 = scalar_lea.vmem %s3818_s26, 2048  ;;  %p3403_p12 = scmp.lt.s32.totalorder %s3818_s26, %s3818_s26 }
  0x4f   : > { %p3396_p5 = scmp.ne.s32.totalorder %s3818_s26, %s3395_s23  ;;  %p3404_p0 = scmp.lt.s32.totalorder %s3395_s23, %s3395_s23 }
  0x51   : > { %p3398_p7 = pnand %p3396_p5, %p3828_p13  ;;  %p3405_p1 = por %p3404_p0, %p3403_p12 }
  0x53   : > { %p3399_p9 = pneg %p3398_p7 }
  0x55   : > { %p3406_p2 = pnand %p3405_p1, %p3399_p9 }
  0x57   : > { %3409 = shalt.err (!%p3406_p2)
}
  0x58   : > { %3257 = dma.hbm_to_vmem [thread:$0]  (!%p3814_p11), %s4467_s6, 2048, %s3818_s26, [#allocation12], %s4424_s27, %s4424_s27, %s4426_s14  }
  0x59   : > { %s3879_s12 = sadd.s32 1, %s3672_s16   ;;  %s45_s13 = sadd.s32 1, %s3668_s15 }
  0x5a   : > { %4468 = sst [smem:[#allocation28_spill]] %s3879_s12  ;;  %s42_s28 = ssub.s32 %s3672_s16, %s3879_s12 }
  0x5b   : > { %p52_p6 = scmp.ne.s32.totalorder %s3668_s15, %s3664_s30  ;;  %p43_p10 = scmp.eq.s32.totalorder %s42_s28, 0 }
  0x5c   : > { %p53_p3 = scmp.eq.s32.totalorder %s3672_s16, 0  ;;  %p4469_p5 = scmp.eq.s32.totalorder %s3784_s17, 1 }
  0x5d   : > { %p3285_p9 = scmp.lt.s32.totalorder %s3672_s16, 2  ;;  %s3898_s25 = sand.u32 1, %s3668_s15  }
  0x5e   : > { %p3889_p7 = por %p4469_p5, %p52_p6  ;;  %p54_p12 = por %p53_p3, %p52_p6 }
  0x5f   : > { %s3895_s22 = scalar_select %p43_p10, %s3668_s15, %s45_s13  }
  0x60   : > { %s4470_s18 = scalar_select %p3889_p7, 1, 0 }
  0x61   : > { %4472 = sst [smem:[#allocation30_spill]] %s3895_s22  ;;  %s3901_s26 = smul.u32 40, %s3898_s25 }
  0x62   : > { %4471 = sst [smem:[#allocation29_spill]] %s4470_s18  ;;  %s3905_s23 = smul.u32 640, %s3672_s16 }
  0x63   : > { %p3907_p0 = pnand %p3285_p9, %p54_p12  ;;  %s4474_s1 = sld [smem:[#allocation31_spill]] }
  0x64   : > { %s491_s27 = scalar_lea.vmem [#allocation5], %s3901_s26  ;;  %s3678_s20 = smov [#allocation13]  }
  0x65   : > { %s4473_s9 = scalar_select %p3907_p0, 1, 0 }
  0x66   : > { %s498_s14 = sshll.u32 %s491_s27, 4  ;;  %s3920_s4 = sshll.u32 %s3678_s20, 4  ;;  %s3918_s14 = int_to_ptr.vmem [resolvable:$true] %s498_s14  ;;  %s428_s4 = int_to_ptr.vmem [resolvable:$true] %s3920_s4 }
  0x67   : > { %s4475_s6 = sand.u32 1, %s3672_s16   ;;  %p3930_p2 = pneg %p3907_p0 }
  0x68   : > { %s3924_s22 = scalar_lea.sflag [#allocation6], %s4475_s6 }
  0x69   : > { %s3915_s13 = scalar_lea.hbm %s4474_s1, %s3905_s23  ;;  %s3415_s12 = scalar_lea.hbm %s4474_s1, 1280 }
  0x6a   : > { %s3410_s15 = scalar_lea.hbm %s3915_s13, 640  ;;  %p3416_p3 = scmp.lt.u32.totalorder %s3915_s13, %s4474_s1 }
  0x6b   : > { %p3411_p1 = scmp.ne.s32.totalorder %s3915_s13, %s3410_s15  ;;  %p3417_p5 = scmp.lt.u32.totalorder %s3415_s12, %s3410_s15 }
  0x6c   : > { %s4476_s11 = scalar_select %p3930_p2, 1, 0 }
  0x6d   : > { %p3413_p6 = pnand %p3930_p2, %p3411_p1  ;;  %p3418_p9 = por %p3417_p5, %p3416_p3 }
  0x6e   : > { %p3419_p12 = scmp.lt.u32.totalorder %s3410_s15, %s3915_s13 }
  0x6f   : > { %p3414_p10 = pneg %p3413_p6 }
  0x70   : > { %p3420_p7 = por %p3419_p12, %p3418_p9 }
  0x72   : > { %p3421_p4 = pnand %p3420_p7, %p3414_p10 }
  0x74   : > { %3424 = shalt.err (!%p3421_p4)
}
  0x75   : > { %s3425_s6 = scalar_lea.vmem %s3918_s14, 640  ;;  %s3679_s27 = smov [#allocation5]  }
  0x76   : > { %p3426_p1 = scmp.ne.s32.totalorder %s3918_s14, %s3425_s6  ;;  %s3430_s28 = sshll.u32 %s3679_s27, 4  ;;  %s3431_s28 = int_to_ptr.vmem [resolvable:$false] %s3430_s28 }
  0x77   : > { %s3432_s18 = scalar_lea.vmem %s3431_s28, 1280  ;;  %p3433_p11 = scmp.lt.s32.totalorder %s3918_s14, %s3431_s28 }
  0x78   : > { %p3428_p6 = pnand %p3426_p1, %p3930_p2  ;;  %p3434_p13 = scmp.lt.s32.totalorder %s3432_s18, %s3425_s6 }
  0x7a   : > { %p3429_p8 = pneg %p3428_p6  ;;  %p3435_p3 = por %p3434_p13, %p3433_p11 }
  0x7c   : > { %p3436_p5 = pnand %p3435_p3, %p3429_p8 }
  0x7e   : > { %3439 = shalt.err (!%p3436_p5)
}
  0x7f   : > { %s4477_s15 = smov 8   ;;  %s4478_s12 = smov 128  }
  0x80   : > { %3270 = dma.hbm_to_vmem [thread:$0]  (!%p3907_p0), %s3915_s13, 640, %s3918_s14, %s3924_s22, %s4478_s12, %s4478_s12, %s4477_s15  }
  0x81   : > { %s3440_s28 = scalar_lea.hbm %s4413_s8, 2048  ;;  %p4479_p8 = scmp.ne.s32.totalorder %s4466_s29, 0 }
  0x82   : > { %p3441_p4 = scmp.ne.s32.totalorder %s4413_s8, %s3440_s28  ;;  %p3447_p7 = scmp.lt.u32.totalorder %s3440_s28, %s4413_s8 }
  0x84   : > { %p3443_p11 = pnand %p3441_p4, %p4479_p8 }
  0x86   : > { %p3444_p13 = pneg %p3443_p11 }
  0x88   : > { %p3449_p10 = pnand %p3447_p7, %p3444_p13 }
  0x8a   : > { %3452 = shalt.err (!%p3449_p10)
}
  0x8b   : > { %s3453_s7 = scalar_lea.vmem %s428_s4, 2048  ;;  %p3461_p6 = scmp.lt.s32.totalorder %s428_s4, %s428_s4 }
  0x8c   : > { %p3454_p9 = scmp.ne.s32.totalorder %s428_s4, %s3453_s7  ;;  %p3462_p3 = scmp.lt.s32.totalorder %s3453_s7, %s3453_s7 }
  0x8e   : > { %p3456_p12 = pnand %p3454_p9, %p4479_p8  ;;  %p3463_p5 = por %p3462_p3, %p3461_p6 }
  0x90   : > { %p3457_p1 = pneg %p3456_p12 }
  0x92   : > { %p3464_p0 = pnand %p3463_p5, %p3457_p1 }
  0x94   : > { %3467 = shalt.err (!%p3464_p0)
}
  0x95   : > { %p4480_p4 = scmp.ne.s32.totalorder %s4464_s24, 0  ;;  %s3680_s14 = smov [#allocation14]  }
  0x96   : > { %s443_s13 = sshll.u32 %s3680_s14, 4  ;;  %s3468_s7 = scalar_lea.hbm %s4415_s10, 10240  ;;  %s444_s13 = int_to_ptr.vmem [resolvable:$true] %s443_s13 }
  0x97   : > { %3260 = dma.hbm_to_vmem [thread:$0]  (!%p4480_p4), %s4413_s8, 2048, %s428_s4, [#allocation12], %s4478_s12, %s4478_s12, %s4477_s15  }
  0x98   : > { %p3469_p0 = scmp.ne.s32.totalorder %s4415_s10, %s3468_s7  ;;  %p3475_p7 = scmp.lt.u32.totalorder %s3468_s7, %s4415_s10 }
  0x9a   : > { %p3471_p11 = pnand %p3469_p0, %p4479_p8 }
  0x9c   : > { %p3472_p13 = pneg %p3471_p11 }
  0x9e   : > { %p3477_p10 = pnand %p3475_p7, %p3472_p13 }
  0xa0   : > { %3480 = shalt.err (!%p3477_p10)
}
  0xa1   : > { %s3481_s4 = scalar_lea.vmem %s444_s13, 10240  ;;  %p3489_p6 = scmp.lt.s32.totalorder %s444_s13, %s444_s13 }
  0xa2   : > { %p3482_p9 = scmp.ne.s32.totalorder %s444_s13, %s3481_s4  ;;  %p3490_p3 = scmp.lt.s32.totalorder %s3481_s4, %s3481_s4 }
  0xa4   : > { %p3484_p12 = pnand %p3482_p9, %p4479_p8  ;;  %p3491_p5 = por %p3490_p3, %p3489_p6 }
  0xa6   : > { %p3485_p1 = pneg %p3484_p12 }
  0xa8   : > { %p3492_p2 = pnand %p3491_p5, %p3485_p1 }
  0xaa   : > { %3495 = shalt.err (!%p3492_p2)
}
  0xab   : > { %3263 = dma.hbm_to_vmem [thread:$0]  (!%p4480_p4), %s4415_s10, 10240, %s444_s13, [#allocation15], %s4478_s12, %s4478_s12, %s4477_s15  }
  0xac   : > { %s4004_s14 = scalar_lea.hbm %s4405_s0, %s3905_s23  ;;  %s470_s24 = scalar_lea.vmem [#allocation2], %s3901_s26 }
  0xad   : > { %s477_s20 = sshll.u32 %s470_s24, 4  ;;  %s467_s27 = scalar_lea.sflag [#allocation3], %s3898_s25  ;;  %s4007_s20 = int_to_ptr.vmem [resolvable:$true] %s477_s20 }
  0xae   : > { %s3496_s7 = scalar_lea.hbm %s4004_s14, 640  ;;  %p4481_p8 = scmp.ne.s32.totalorder %s4476_s11, 0 }
  0xaf   : > { %p3497_p2 = scmp.ne.s32.totalorder %s4004_s14, %s3496_s7  ;;  %s3501_s6 = scalar_lea.hbm %s4405_s0, 1280 }
  0xb0   : > { %p3502_p4 = scmp.lt.u32.totalorder %s4004_s14, %s4405_s0  ;;  %p3503_p13 = scmp.lt.u32.totalorder %s3501_s6, %s3496_s7 }
  0xb1   : > { %p3499_p0 = pnand %p3497_p2, %p4481_p8  ;;  %p3505_p10 = scmp.lt.u32.totalorder %s3496_s7, %s4004_s14 }
  0xb2   : > { %p3504_p7 = por %p3503_p13, %p3502_p4 }
  0xb3   : > { %p3500_p11 = pneg %p3499_p0 }
  0xb4   : > { %p3506_p9 = por %p3505_p10, %p3504_p7 }
  0xb6   : > { %p3507_p12 = pnand %p3506_p9, %p3500_p11 }
  0xb8   : > { %3510 = shalt.err (!%p3507_p12)
}
  0xb9   : > { %s3511_s17 = scalar_lea.vmem %s4007_s20, 640  ;;  %s3681_s1 = smov [#allocation2]  }
  0xba   : > { %p3512_p1 = scmp.ne.s32.totalorder %s4007_s20, %s3511_s17  ;;  %s3516_s29 = sshll.u32 %s3681_s1, 4  ;;  %s3517_s29 = int_to_ptr.vmem [resolvable:$false] %s3516_s29 }
  0xbb   : > { %s3518_s5 = scalar_lea.vmem %s3517_s29, 1280  ;;  %p3519_p5 = scmp.lt.s32.totalorder %s4007_s20, %s3517_s29 }
  0xbc   : > { %p3514_p6 = pnand %p3512_p1, %p4481_p8  ;;  %p3520_p2 = scmp.lt.s32.totalorder %s3518_s5, %s3511_s17 }
  0xbe   : > { %p3515_p3 = pneg %p3514_p6  ;;  %p3521_p0 = por %p3520_p2, %p3519_p5 }
  0xc0   : > { %p3522_p4 = pnand %p3521_p0, %p3515_p3 }
  0xc2   : > { %3525 = shalt.err (!%p3522_p4)
}
  0xc3   : > { %p4482_p11 = scmp.ne.s32.totalorder %s4473_s9, 0  ;;  %s4040_s13 = scalar_lea.hbm %s4407_s2, %s3905_s23 }
  0xc4   : > { %s512_s28 = scalar_lea.vmem [#allocation7], %s3901_s26  ;;  %s3526_s18 = scalar_lea.hbm %s4040_s13, 640 }
  0xc5   : > { %3267 = dma.hbm_to_vmem [thread:$0]  (!%p4482_p11), %s4004_s14, 640, %s4007_s20, %s467_s27, %s4478_s12, %s4478_s12, %s4477_s15  }
  0xc6   : > { %s519_s6 = sshll.u32 %s512_s28, 4  ;;  %p3527_p13 = scmp.ne.s32.totalorder %s4040_s13, %s3526_s18  ;;  %s4043_s6 = int_to_ptr.vmem [resolvable:$true] %s519_s6 }
  0xc7   : > { %s3531_s20 = scalar_lea.hbm %s4407_s2, 1280  ;;  %p3532_p9 = scmp.lt.u32.totalorder %s4040_s13, %s4407_s2 }
  0xc8   : > { %p3529_p7 = pnand %p3527_p13, %p4481_p8  ;;  %p3533_p12 = scmp.lt.u32.totalorder %s3531_s20, %s3526_s18 }
  0xc9   : > { %p3535_p6 = scmp.lt.u32.totalorder %s3526_s18, %s4040_s13 }
  0xca   : > { %p3530_p10 = pneg %p3529_p7  ;;  %p3534_p1 = por %p3533_p12, %p3532_p9 }
  0xcc   : > { %p3536_p3 = por %p3535_p6, %p3534_p1 }
  0xce   : > { %p3537_p5 = pnand %p3536_p3, %p3530_p10 }
  0xd0   : > { %3540 = shalt.err (!%p3537_p5)
}
  0xd1   : > { %s3541_s26 = scalar_lea.vmem %s4043_s6, 640  ;;  %s3682_s17 = smov [#allocation7]  }
  0xd2   : > { %p3542_p2 = scmp.ne.s32.totalorder %s4043_s6, %s3541_s26  ;;  %s3546_s1 = sshll.u32 %s3682_s17, 4  ;;  %s3547_s1 = int_to_ptr.vmem [resolvable:$false] %s3546_s1 }
  0xd3   : > { %s3548_s29 = scalar_lea.vmem %s3547_s1, 1280  ;;  %p3549_p13 = scmp.lt.s32.totalorder %s4043_s6, %s3547_s1 }
  0xd4   : > { %p3544_p0 = pnand %p3542_p2, %p4481_p8  ;;  %p3550_p7 = scmp.lt.s32.totalorder %s3548_s29, %s3541_s26 }
  0xd6   : > { %p3545_p4 = pneg %p3544_p0  ;;  %p3551_p9 = por %p3550_p7, %p3549_p13 }
  0xd8   : > { %p3552_p12 = pnand %p3551_p9, %p3545_p4 }
  0xda   : > { %3555 = shalt.err (!%p3552_p12)
}
  0xdb   : > { %3273 = dma.hbm_to_vmem [thread:$0]  (!%p4482_p11), %s4040_s13, 640, %s4043_s6, %s3924_s22, %s4478_s12, %s4478_s12, %s4477_s15  }
  0xdc   : > { %s2467_s5 = sshll.u32 %s3898_s25, 3  ;;  %s2468_s24 = sshll.u32 %s3672_s16, 7 }
  0xdd   : > { %s4075_s18 = scalar_lea.hbm %s4408_s3, %s2468_s24  ;;  %s533_s4 = scalar_lea.vmem [#allocation8], %s2467_s5 }
  0xde   : > { %s540_s14 = sshll.u32 %s533_s4, 4  ;;  %s4483_s20 = sand.u32 1, %s3672_s16   ;;  %s541_s14 = int_to_ptr.vmem [resolvable:$true] %s540_s14 }
  0xdf   : > { %s530_s27 = scalar_lea.sflag [#allocation9], %s4483_s20  ;;  %s3556_s23 = scalar_lea.hbm %s4075_s18, 128 }
  0xe0   : > { %p3557_p10 = scmp.ne.s32.totalorder %s4075_s18, %s3556_s23  ;;  %s3561_s15 = scalar_lea.hbm %s4408_s3, 256 }
  0xe1   : > { %p3562_p3 = scmp.lt.u32.totalorder %s4075_s18, %s4408_s3  ;;  %p3563_p5 = scmp.lt.u32.totalorder %s3561_s15, %s3556_s23 }
  0xe2   : > { %p3559_p1 = pnand %p3557_p10, %p4481_p8  ;;  %p3565_p0 = scmp.lt.u32.totalorder %s3556_s23, %s4075_s18 }
  0xe3   : > { %p3564_p2 = por %p3563_p5, %p3562_p3 }
  0xe4   : > { %p3560_p6 = pneg %p3559_p1 }
  0xe5   : > { %p3566_p4 = por %p3565_p0, %p3564_p2 }
  0xe7   : > { %p3567_p13 = pnand %p3566_p4, %p3560_p6 }
  0xe9   : > { %3570 = shalt.err (!%p3567_p13)
}
  0xea   : > { %s3571_s6 = scalar_lea.vmem %s541_s14, 128  ;;  %s3683_s26 = smov [#allocation8]  }
  0xeb   : > { %p3572_p7 = scmp.ne.s32.totalorder %s541_s14, %s3571_s6  ;;  %s3576_s17 = sshll.u32 %s3683_s26, 4  ;;  %s3577_s17 = int_to_ptr.vmem [resolvable:$false] %s3576_s17 }
  0xec   : > { %s3578_s1 = scalar_lea.vmem %s3577_s17, 256  ;;  %p3579_p10 = scmp.lt.s32.totalorder %s541_s14, %s3577_s17 }
  0xed   : > { %p3574_p9 = pnand %p3572_p7, %p4481_p8  ;;  %p3580_p1 = scmp.lt.s32.totalorder %s3578_s1, %s3571_s6 }
  0xef   : > { %p3575_p12 = pneg %p3574_p9  ;;  %p3581_p11 = por %p3580_p1, %p3579_p10 }
  0xf1   : > { %p3582_p3 = pnand %p3581_p11, %p3575_p12 }
  0xf3   : > { %3585 = shalt.err (!%p3582_p3)
}
  0xf4   : > { %p4484_p5 = scmp.ne.s32.totalorder %s4473_s9, 0  ;;  %p4485_p6 = scmp.ne.s32.totalorder %s4463_s21, 0 }
  0xf5   : > { %s4099_s11 = sand.u32 (!%p4485_p6), 1, %s3664_s30   ;;  %p4486_p8 = scmp.ne.s32.totalorder (!%p4485_p6), %s4460_s19, 0 }
  0xf6   : > { %3276 = dma.hbm_to_vmem [thread:$0]  (!%p4484_p5), %s4075_s18, 128, %s541_s14, %s530_s27  }
  0xf7   : > { %549 = sbr.rel (%p4485_p6) target bundleno = 1881 (0x759), region = 76  ;;  %s552_s5 = scalar_lea.sflag (!%p4485_p6), [#allocation3], %s4099_s11 }
  0xf8   : > { %s3224_s29 = smul.u32 (!%p4485_p6), 40, %s4099_s11 }
  0xfa   : > { %s4103_s24 = scalar_lea.vmem (!%p4485_p6), [#allocation2], %s3224_s29 }
  0xfe   : > { %3631 = dma.done.wait (%p4486_p8), %s552_s5, 640  }
  0xff   : > { %3633 = vsyncadd (%p4486_p8), %s552_s5, 4294966656  ;;  %s4487_s9 = sld [smem:[#allocation26_spill]]  ;;  %s4110_s28 = scalar_lea.vmem [#allocation5], %s3224_s29 }
 0x105   : > { %s560_s7 = sand.u32 1, %s4487_s9  }
 0x106   : > { %s561_s21 = scalar_lea.sflag [#allocation6], %s560_s7 }
 0x107   : > { %3635 = dma.done.wait (%p4486_p8), %s561_s21, 1280  }
 0x108   : > { %3637 = vsyncadd (%p4486_p8), %s561_s21, 4294966016  ;;  %s2470_s18 = sshll.u32 %s4099_s11, 3  ;;  %s4117_s4 = scalar_lea.vmem [#allocation7], %s3224_s29 }
 0x109   : > { %s579_s14 = scalar_lea.sflag [#allocation9], %s560_s7  ;;  %s4121_s20 = scalar_lea.vmem [#allocation8], %s2470_s18 }
 0x10a   : > { %3639 = dma.done.wait (%p4486_p8), %s579_s14, 128  }
 0x10b   : > { %3641 = vsyncadd (%p4486_p8), %s579_s14, 4294967168  ;;  %p4488_p11 = scmp.eq.s32.totalorder %s4487_s9, 0 }
 0x10d   : > { %3643 = dma.done.wait (%p4488_p11), [#allocation9], 2048   ;;  %p4489_p2 = pmov %p4488_p11 }
 0x10f   : > { %3645 = vsyncadd (%p4489_p2), [#allocation9], 4294965248  ;;  %p4490_p0 = pmov %p4489_p2 }
 0x111   : > { %3647 = dma.done.wait (%p4490_p0), [#allocation12], 4096   ;;  %p4491_p4 = pmov %p4490_p0 }
 0x112   : > { %p4492_p13 = pmov %p4490_p0 }
 0x113   : > { %3649 = vsyncadd (%p4491_p4), [#allocation12], 4294963200 }
 0x114   : > { %3651 = dma.done.wait (%p4492_p13), [#allocation15], 10240   ;;  %p4493_p7 = pmov %p4490_p0 }
 0x115   : > { %v3684_v0 = vmov 0.0|0.0   ;;  %vm3685_vm0 = vmmov 0   ;;  %v3686_v1 = vmov 0.0   ;;  %v781_v2 = vld [vmem:[#allocation11] sm:$0xff]  ;;  %v782_v3 = vld [vmem:[#allocation11 + $0x8] sm:$0xff]  ;;  %v783_v7 = vld [vmem:[#allocation11 + $0x10] sm:$0xff] }
 0x116   : > { %3653 = vsyncadd (%p4493_p7), [#allocation15], 4294957056  ;;  %3050 = vmatprep.subr.bf16.mxu1 %v3684_v0  ;;  %3026 = vmatprep.subr.bf16.mxu0 %v3684_v0  ;;  %v663_v4 = vld [vmem:[#allocation10] sm:$0xff]  ;;  %v3051_v5 = vpack.c.bf16 %v782_v3, %v781_v2  ;;  %v664_v6 = vld [vmem:[#allocation10 + $0x8] sm:$0xff]  ;;  %s4494_s23 = sld [smem:[#allocation35_spill]]  ;;  %s4495_s15 = sld [smem:[#allocation33_spill]] }
 0x117   : > { %2739 = vmatprep.mubr.msk.f32.mxu1 %vm3685_vm0, %v3686_v1  ;;  %2692 = vmatprep.mubr.msk.f32.mxu0 %vm3685_vm0, %v3686_v1  ;;  %v784_v8 = vld [vmem:[#allocation11 + $0x18] sm:$0xff]  ;;  %v3027_v9 = vpack.c.bf16 %v664_v6, %v663_v4  ;;  %v665_v10 = vld [vmem:[#allocation10 + $0x10] sm:$0xff]  ;;  %v785_v14 = vld [vmem:[#allocation11 + $0x20] sm:$0xff]  ;;  %vm1367_vm1 = vcmask 64512   ;;  %s4496_s6 = sld [smem:[#allocation36_spill]]  ;;  %s4497_s1 = sld [smem:[#allocation37_spill]] }
 0x118   : > { %v666_v11 = vld [vmem:[#allocation10 + $0x18] sm:$0xff]  ;;  %3052 = vmatpush3.bf16.msra.mxu1 %v3051_v5  ;;  %v3054_v12 = vpack.c.bf16 %v784_v8, %v783_v7  ;;  %v786_v15 = vld [vmem:[#allocation11 + $0x28] sm:$0xff]  ;;  %v667_v16 = vld [vmem:[#allocation10 + $0x20] sm:$0xff]  ;;  %s4498_s29 = sld [smem:[#allocation29_spill]]  ;;  %s4499_s7 = sld [smem:[#allocation38_spill]] }
 0x119   : > { %3028 = vmatpush3.bf16.msra.mxu0 %v3027_v9  ;;  %3053 = vmatprep.subr.bf16.mxu1 %v3684_v0  ;;  %v3030_v13 = vpack.c.bf16 %v666_v11, %v665_v10  ;;  %v668_v17 = vld [vmem:[#allocation10 + $0x28] sm:$0xff]  ;;  %v3057_v18 = vpack.c.bf16 %v786_v15, %v785_v14  ;;  %v787_v20 = vld [vmem:[#allocation11 + $0x30] sm:$0xff]  ;;  %v788_v21 = vld [vmem:[#allocation11 + $0x38] sm:$0xff]  ;;  %s2489_s14 = sshll.u32 %s4487_s9, 7  ;;  %s4501_s22 = sld [smem:[#allocation40_spill]] }
 0x11a   : > { %3029 = vmatprep.subr.bf16.mxu0 %v3684_v0  ;;  %v3033_v19 = vpack.c.bf16 %v668_v17, %v667_v16  ;;  %v669_v22 = vld [vmem:[#allocation10 + $0x30] sm:$0xff]  ;;  %v670_v23 = vld [vmem:[#allocation10 + $0x38] sm:$0xff]  ;;  %v3060_v24 = vpack.c.bf16 %v788_v21, %v787_v20  ;;  %v789_v26 = vld [vmem:[#allocation11 + $0x40] sm:$0xff]  ;;  %s3687_s9 = smov [#allocation16]  }
 0x11b   : > { %v3036_v25 = vpack.c.bf16 %v670_v23, %v669_v22  ;;  %v790_v27 = vld [vmem:[#allocation11 + $0x48] sm:$0xff]  ;;  %v671_v28 = vld [vmem:[#allocation10 + $0x40] sm:$0xff]  ;;  %v791_v32 = vld [vmem:[#allocation11 + $0x50] sm:$0xff] }
 0x11c   : > { %3055 = vmatpush3.bf16.msra.mxu1 %v3054_v12  ;;  %v672_v29 = vld [vmem:[#allocation10 + $0x48] sm:$0xff]  ;;  %v3063_v30 = vpack.c.bf16 %v790_v27, %v789_v26  ;;  %v792_v33 = vld [vmem:[#allocation11 + $0x58] sm:$0xff]  ;;  %v673_v34 = vld [vmem:[#allocation10 + $0x50] sm:$0xff] }
 0x11d   : > { %3031 = vmatpush3.bf16.msra.mxu0 %v3030_v13  ;;  %3056 = vmatprep.subr.bf16.mxu1 %v3684_v0  ;;  %v3039_v31 = vpack.c.bf16 %v672_v29, %v671_v28  ;;  %v674_v35 = vld [vmem:[#allocation10 + $0x58] sm:$0xff]  ;;  %v3066_v36 = vpack.c.bf16 %v792_v33, %v791_v32  ;;  %v793_v38 = vld [vmem:[#allocation11 + $0x60] sm:$0xff]  ;;  %v794_v39 = vld [vmem:[#allocation11 + $0x68] sm:$0xff] }
 0x11e   : > { %3032 = vmatprep.subr.bf16.mxu0 %v3684_v0  ;;  %v3042_v37 = vpack.c.bf16 %v674_v35, %v673_v34  ;;  %v675_v40 = vld [vmem:[#allocation10 + $0x60] sm:$0xff]  ;;  %v676_v41 = vld [vmem:[#allocation10 + $0x68] sm:$0xff]  ;;  %v3069_v42 = vpack.c.bf16 %v794_v39, %v793_v38  ;;  %v795_v44 = vld [vmem:[#allocation11 + $0x70] sm:$0xff]  ;;  %p4502_p12 = scmp.ne.s32.totalorder %s4498_s29, 0 }
 0x11f   : > { %v3045_v43 = vpack.c.bf16 %v676_v41, %v675_v40  ;;  %v796_v45 = vld [vmem:[#allocation11 + $0x78] sm:$0xff]  ;;  %v677_v46 = vld [vmem:[#allocation10 + $0x70] sm:$0xff]  ;;  %v658_v51 = vld [vmem:[%s4103_s24] sm:$0xff]  ;;  %s4361_s25 = scalar_lea.hbm %s4501_s22, %s2489_s14 }
 0x120   : > { %3058 = vmatpush3.bf16.msra.mxu1 %v3057_v18  ;;  %v678_v47 = vld [vmem:[#allocation10 + $0x78] sm:$0xff]  ;;  %v3072_v48 = vpack.c.bf16 %v796_v45, %v795_v44  ;;  %v659_v53 = vld [vmem:[%s4103_s24 + $0x8] sm:$0xff]  ;;  %v778_v54 = vld [vmem:[%s4110_s28 + $0x10] sm:$0xff] }
 0x121   : > { %3034 = vmatpush3.bf16.msra.mxu0 %v3033_v19  ;;  %3059 = vmatprep.subr.bf16.mxu1 %v3684_v0  ;;  %v3048_v49 = vpack.c.bf16 %v678_v47, %v677_v46  ;;  %v776_v50 = vld [vmem:[%s4110_s28] sm:$0xff]  ;;  %v777_v52 = vld [vmem:[%s4110_s28 + $0x8] sm:$0xff]  ;;  %v779_v56 = vld [vmem:[%s4110_s28 + $0x18] sm:$0xff] }
 0x122   : > { %3035 = vmatprep.subr.bf16.mxu0 %v3684_v0  ;;  %v660_v55 = vld [vmem:[%s4103_s24 + $0x10] sm:$0xff]  ;;  %v661_v57 = vld [vmem:[%s4103_s24 + $0x18] sm:$0xff]  ;;  %v662_v59 = vld [vmem:[%s4103_s24 + $0x20] sm:$0xff] }
 0x123   : > { %v780_v58 = vld [vmem:[%s4110_s28 + $0x20] sm:$0xff]  ;;  %v2477_v60 = vld [vmem:[%s4494_s23] ss:$0 sm:$0xff] }
 0x124   : > { %3061 = vmatpush3.bf16.msra.mxu1 %v3060_v24  ;;  %v2476_v61 = vld [vmem:[%s4495_s15] ss:$0 sm:$0xff]  ;;  %v901_v32 = vld [vmem:[#allocation13 + $0x10] sm:$0xff]  ;;  %v902_v34 = vld [vmem:[#allocation13 + $0x18] sm:$0xff]  ;;  %s2270_s15 = scalar_lea.sflag [#allocation4], %s4099_s11 }
 0x125   : > { %3037 = vmatpush3.bf16.msra.mxu0 %v3036_v25  ;;  %3062 = vmatprep.subr.bf16.mxu1 %v3684_v0  ;;  %v3078_v35 = vpack.c.bf16 %v902_v34, %v901_v32  ;;  %v905_v39 = vld [vmem:[#allocation13 + $0x30] sm:$0xff]  ;;  %v906_v40 = vld [vmem:[#allocation13 + $0x38] sm:$0xff] }
 0x126   : > { %3038 = vmatprep.subr.bf16.mxu0 %v3684_v0  ;;  %v3084_v41 = vpack.c.bf16 %v906_v40, %v905_v39  ;;  %v909_v45 = vld [vmem:[#allocation13 + $0x50] sm:$0xff]  ;;  %v910_v46 = vld [vmem:[#allocation13 + $0x58] sm:$0xff] }
 0x127   : > { %v3090_v47 = vpack.c.bf16 %v910_v46, %v909_v45 }
 0x128   : > { %3064 = vmatpush3.bf16.msra.mxu1 %v3063_v30  ;;  %v899_v30 = vld [vmem:[#allocation13] sm:$0xff] }
 0x129   : > { %3040 = vmatpush3.bf16.msra.mxu0 %v3039_v31  ;;  %3065 = vmatprep.subr.bf16.mxu1 %v3684_v0  ;;  %v900_v31 = vld [vmem:[#allocation13 + $0x8] sm:$0xff] }
 0x12a   : > { %3041 = vmatprep.subr.bf16.mxu0 %v3684_v0  ;;  %v3075_v33 = vpack.c.bf16 %v900_v31, %v899_v30 }
 0x12c   : > { %3067 = vmatpush3.bf16.msra.mxu1 %v3066_v36  ;;  %v903_v36 = vld [vmem:[#allocation13 + $0x20] sm:$0xff] }
 0x12d   : > { %3043 = vmatpush3.bf16.msra.mxu0 %v3042_v37  ;;  %3068 = vmatprep.subr.bf16.mxu1 %v3684_v0  ;;  %v904_v37 = vld [vmem:[#allocation13 + $0x28] sm:$0xff] }
 0x12e   : > { %3044 = vmatprep.subr.bf16.mxu0 %v3684_v0  ;;  %v3081_v38 = vpack.c.bf16 %v904_v37, %v903_v36 }
 0x130   : > { %3070 = vmatpush3.bf16.msra.mxu1 %v3069_v42  ;;  %v907_v42 = vld [vmem:[#allocation13 + $0x40] sm:$0xff] }
 0x131   : > { %3046 = vmatpush3.bf16.msra.mxu0 %v3045_v43  ;;  %3071 = vmatprep.subr.bf16.mxu1 %v3684_v0  ;;  %v908_v43 = vld [vmem:[#allocation13 + $0x48] sm:$0xff] }
 0x132   : > { %3047 = vmatprep.subr.bf16.mxu0 %v3684_v0  ;;  %v3087_v44 = vpack.c.bf16 %v908_v43, %v907_v42  ;;  %v2478_v43 = vld [vmem:[%s4496_s6] ss:$0 sm:$0xff] }
 0x134   : > { %3073 = vmatpush3.bf16.msra.mxu1 %v3072_v48  ;;  %v911_v48 = vld [vmem:[#allocation13 + $0x60] sm:$0xff] }
 0x135   : > { %3049 = vmatpush3.bf16.msra.mxu0 %v3048_v49  ;;  %2801 = vmatprep.subr.mxu1 %v3686_v1  ;;  %v912_v49 = vld [vmem:[#allocation13 + $0x68] sm:$0xff] }
 0x136   : > { %3074 = vmatprep.subr.bf16.mxu0 %v3684_v0 }
 0x137   : > { %2740 = vmatmul.mubr.f32.vlgmr.msra.gmra.mrb[0].mxu1 %v776_v50  ;;  %v3093_v50 = vpack.c.bf16 %v912_v49, %v911_v48 }
 0x138   : > { %2693 = vmatmul.mubr.f32.vlgmr.msra.gmra.mrb[0].mxu0 %v658_v51  ;;  %2742 = vmatprep.mubr.msk.f32.mxu1 %vm3685_vm0, %v3686_v1  ;;  %v913_v51 = vld [vmem:[#allocation13 + $0x70] sm:$0xff] }
 0x139   : > { %2695 = vmatprep.mubr.msk.f32.mxu0 %vm3685_vm0, %v3686_v1  ;;  %3076 = vmatpush3.bf16.msra.mxu0 %v3075_v33 }
 0x13a   : > { %3077 = vmatprep.subr.bf16.mxu0 %v3684_v0 }
 0x13b   : > { %2743 = vmatmul.mubr.f32.gmra.mrb[2].mxu1 %v777_v52  ;;  %v914_v52 = vld [vmem:[#allocation13 + $0x78] sm:$0xff] }
 0x13c   : > { %2696 = vmatmul.mubr.f32.gmra.mrb[2].mxu0 %v659_v53  ;;  %2745 = vmatprep.mubr.msk.f32.mxu1 %vm3685_vm0, %v3686_v1  ;;  %v3096_v53 = vpack.c.bf16 %v914_v52, %v913_v51 }
 0x13d   : > { %2698 = vmatprep.mubr.msk.f32.mxu0 %vm3685_vm0, %v3686_v1  ;;  %3079 = vmatpush3.bf16.msra.mxu0 %v3078_v35 }
 0x13e   : > { %3080 = vmatprep.subr.bf16.mxu0 %v3684_v0 }
 0x13f   : > { %2746 = vmatmul.mubr.f32.gmra.mrb[4].mxu1 %v778_v54  ;;  %v894_v54 = vld [vmem:[%s4117_s4] sm:$0xff] }
 0x140   : > { %2699 = vmatmul.mubr.f32.gmra.mrb[4].mxu0 %v660_v55  ;;  %2748 = vmatprep.mubr.msk.f32.mxu1 %vm3685_vm0, %v3686_v1  ;;  %v895_v55 = vld [vmem:[%s4117_s4 + $0x8] sm:$0xff] }
 0x141   : > { %2701 = vmatprep.mubr.msk.f32.mxu0 %vm3685_vm0, %v3686_v1  ;;  %3082 = vmatpush3.bf16.msra.mxu0 %v3081_v38 }
 0x142   : > { %3083 = vmatprep.subr.bf16.mxu0 %v3684_v0 }
 0x143   : > { %2749 = vmatmul.mubr.f32.gmra.mrb[6].mxu1 %v779_v56  ;;  %v896_v56 = vld [vmem:[%s4117_s4 + $0x10] sm:$0xff] }
 0x144   : > { %2702 = vmatmul.mubr.f32.gmra.mrb[6].mxu0 %v661_v57  ;;  %2751 = vmatprep.mubr.msk.f32.mxu1 %vm3685_vm0, %v3686_v1  ;;  %v897_v57 = vld [vmem:[%s4117_s4 + $0x18] sm:$0xff] }
 0x145   : > { %2704 = vmatprep.mubr.msk.f32.mxu0 %vm3685_vm0, %v3686_v1  ;;  %3085 = vmatpush3.bf16.msra.mxu0 %v3084_v41 }
 0x146   : > { %3086 = vmatprep.subr.bf16.mxu0 %v3684_v0 }
 0x147   : > { %2752 = vmatmul.mubr.f32.gmra.mrb[8].mxu1 %v780_v58  ;;  %v898_v58 = vld [vmem:[%s4117_s4 + $0x20] sm:$0xff]  ;;  %s4500_s4 = sld [smem:[#allocation39_spill]] }
 0x148   : > { %2705 = vmatmul.mubr.f32.gmra.mrb[8].mxu0 %v662_v59  ;;  %2803 = vmatprep.mubr.msk.f32.mxu1 %vm3685_vm0, %v3686_v1 }
 0x149   : > { %2786 = vmatprep.mubr.msk.f32.mxu0 %vm3685_vm0, %v3686_v1  ;;  %3088 = vmatpush3.bf16.msra.mxu0 %v3087_v44 }
 0x14a   : > { %3089 = vmatprep.subr.bf16.mxu0 %v3684_v0 }
 0x14d   : > { %3091 = vmatpush3.bf16.msra.mxu0 %v3090_v47 }
 0x14e   : > { %3092 = vmatprep.subr.bf16.mxu0 %v3684_v0 }
 0x151   : > { %3094 = vmatpush3.bf16.msra.mxu0 %v3093_v50 }
 0x152   : > { %3095 = vmatprep.subr.bf16.mxu0 %v3684_v0 }
 0x155   : > { %3097 = vmatpush3.bf16.msra.mxu0 %v3096_v53 }
 0x156   : > { %3098 = vmatprep.subr.bf16.mxu0 %v3684_v0 }
 0x158   : > { %2787 = vmatmul.mubr.f32.vlgmr.msra.gmra.mrb[10].mxu0 %v894_v54 }
 0x159   : > { %2789 = vmatprep.mubr.msk.f32.mxu0 %vm3685_vm0, %v3686_v1 }
 0x15c   : > { %2790 = vmatmul.mubr.f32.gmra.mrb[12].mxu0 %v895_v55 }
 0x15d   : > { %2792 = vmatprep.mubr.msk.f32.mxu0 %vm3685_vm0, %v3686_v1 }
 0x160   : > { %2793 = vmatmul.mubr.f32.gmra.mrb[14].mxu0 %v896_v56 }
 0x161   : > { %2795 = vmatprep.mubr.msk.f32.mxu0 %vm3685_vm0, %v3686_v1 }
 0x164   : > { %2796 = vmatmul.mubr.f32.gmra.mrb[16].mxu0 %v897_v57 }
 0x165   : > { %2798 = vmatprep.mubr.msk.f32.mxu0 %vm3685_vm0, %v3686_v1 }
 0x168   : > { %2799 = vmatmul.mubr.f32.gmra.mrb[18].mxu0 %v898_v58  ;;  %v1805_v58 = vld [vmem:[#allocation14 + $0x80] sm:$0xff] }
 0x169   : > { %2883 = vmatprep.mubr.msk.f32.mxu0 %vm3685_vm0, %v3686_v1 }
 0x20a   : > { %v870_v62 = vpop.f32.mrb[0].mxu1 }
 0x20b   : > { %v871_v63 = vadd.f32 %v2477_v60, %v870_v62  ;;  %v2741_v2 = vpop.f32.mrb[1].mxu1  ;;  %v752_v3 = vpop.f32.mrb[0].mxu0 }
 0x20c   : > { %v753_v4 = vadd.f32 %v2476_v61, %v752_v3  ;;  %v2694_v5 = vpop.f32.mrb[1].mxu0 }
 0x20d   : > { %2802 = vmatpush3.xpose.msra.mxu1 %v871_v63 }
 0x20e   : > { %v875_v6 = vpop.f32.mrb[2].mxu1  ;;  %2806 = vmatprep.subr.mxu1 %v3686_v1 }
 0x20f   : > { %v876_v7 = vadd.f32 %v2477_v60, %v875_v6  ;;  %v757_v8 = vpop.f32.mrb[2].mxu0  ;;  %v2744_v9 = vpop.f32.mrb[3].mxu1 }
 0x210   : > { %2804 = vmatmul.mubr.f32.vlgmr.msra.gmra.mrb[10].mxu1 %v753_v4  ;;  %v758_v10 = vadd.f32 %v2476_v61, %v757_v8  ;;  %v2697_v11 = vpop.f32.mrb[3].mxu0 }
 0x211   : > { %2807 = vmatpush3.xpose.msra.mxu1 %v876_v7  ;;  %2808 = vmatprep.mubr.msk.f32.mxu1 %vm3685_vm0, %v3686_v1 }
 0x212   : > { %v880_v12 = vpop.f32.mrb[4].mxu1  ;;  %2811 = vmatprep.subr.mxu1 %v3686_v1 }
 0x213   : > { %v881_v13 = vadd.f32 %v2477_v60, %v880_v12  ;;  %v762_v14 = vpop.f32.mrb[4].mxu0  ;;  %v2747_v15 = vpop.f32.mrb[5].mxu1 }
 0x214   : > { %2809 = vmatmul.mubr.f32.vlgmr.msra.gmra.mrb[12].mxu1 %v758_v10  ;;  %v763_v16 = vadd.f32 %v2476_v61, %v762_v14  ;;  %v2700_v17 = vpop.f32.mrb[5].mxu0 }
 0x215   : > { %2812 = vmatpush3.xpose.msra.mxu1 %v881_v13  ;;  %2813 = vmatprep.mubr.msk.f32.mxu1 %vm3685_vm0, %v3686_v1 }
 0x216   : > { %v885_v18 = vpop.f32.mrb[6].mxu1  ;;  %2816 = vmatprep.subr.mxu1 %v3686_v1 }
 0x217   : > { %v886_v19 = vadd.f32 %v2477_v60, %v885_v18  ;;  %v767_v20 = vpop.f32.mrb[6].mxu0  ;;  %v2750_v21 = vpop.f32.mrb[7].mxu1 }
 0x218   : > { %2814 = vmatmul.mubr.f32.vlgmr.msra.gmra.mrb[14].mxu1 %v763_v16  ;;  %v768_v22 = vadd.f32 %v2476_v61, %v767_v20  ;;  %v2703_v23 = vpop.f32.mrb[7].mxu0 }
 0x219   : > { %2817 = vmatpush3.xpose.msra.mxu1 %v886_v19  ;;  %2818 = vmatprep.mubr.msk.f32.mxu1 %vm3685_vm0, %v3686_v1 }
 0x21a   : > { %v890_v24 = vpop.f32.mrb[8].mxu1  ;;  %2821 = vmatprep.subr.mxu1 %v3686_v1 }
 0x21b   : > { %v891_v25 = vadd.f32 %v2477_v60, %v890_v24  ;;  %v772_v26 = vpop.f32.mrb[8].mxu0  ;;  %v2753_v27 = vpop.f32.mrb[9].mxu1 }
 0x21c   : > { %2819 = vmatmul.mubr.f32.vlgmr.msra.gmra.mrb[16].mxu1 %v768_v22  ;;  %v773_v28 = vadd.f32 %v2476_v61, %v772_v26  ;;  %v2706_v29 = vpop.f32.mrb[9].mxu0 }
 0x21d   : > { %2822 = vmatpush3.xpose.msra.mxu1 %v891_v25  ;;  %2823 = vmatprep.mubr.msk.f32.mxu1 %vm3685_vm0, %v3686_v1 }
 0x21e   : > { %2826 = vmatprep.subr.mxu1 %v3686_v1 }
 0x220   : > { %2824 = vmatmul.mubr.f32.vlgmr.msra.gmra.mrb[18].mxu1 %v773_v28 }
 0x221   : > { %2828 = vmatprep.mubr.msk.f32.mxu1 %vm3685_vm0, %v3686_v1 }
 0x22b   : > { %v988_v42 = vpop.f32.mrb[10].mxu0 }
 0x22c   : > { %v2788_v44 = vpop.f32.mrb[11].mxu0  ;;  %v989_v45 = vadd.f32 %v2478_v43, %v988_v42  ;;  %v1795_v42 = vld [vmem:[#allocation14 + $0x38] sm:$0xff] }
 0x22d   : > { %v1796_v44 = vld [vmem:[#allocation14 + $0x40] sm:$0xff] }
 0x22e   : > { %2827 = vmatpush3.msra.mxu1 %v989_v45  ;;  %v1797_v45 = vld [vmem:[#allocation14 + $0x48] sm:$0xff] }
 0x22f   : > { %v993_v46 = vpop.f32.mrb[12].mxu0  ;;  %2831 = vmatprep.subr.mxu1 %v3686_v1 }
 0x230   : > { %v2791_v47 = vpop.f32.mrb[13].mxu0  ;;  %v994_v48 = vadd.f32 %v2478_v43, %v993_v46  ;;  %v3135_v46 = vpack.c.bf16 %v1797_v45, %v1796_v44 }
 0x231   : > { %v1798_v47 = vld [vmem:[#allocation14 + $0x50] sm:$0xff] }
 0x233   : > { %v998_v49 = vpop.f32.mrb[14].mxu0 }
 0x234   : > { %v999_v50 = vadd.f32 %v2478_v43, %v998_v49  ;;  %v2794_v51 = vpop.f32.mrb[15].mxu0 }
 0x235   : > { %v1801_v51 = vld [vmem:[#allocation14 + $0x68] sm:$0xff] }
 0x237   : > { %v1003_v52 = vpop.f32.mrb[16].mxu0 }
 0x238   : > { %v4264_v53 = vadd.f32 %v2478_v43, %v1003_v52  ;;  %v2797_v54 = vpop.f32.mrb[17].mxu0 }
 0x239   : > { %v1803_v54 = vld [vmem:[#allocation14 + $0x78] sm:$0xff] }
 0x23b   : > { %v1008_v55 = vpop.f32.mrb[18].mxu0 }
 0x23c   : > { %v4266_v56 = vadd.f32 %v2478_v43, %v1008_v55  ;;  %v2800_v57 = vpop.f32.mrb[19].mxu0 }
 0x23d   : > { %v1820_v57 = vld [vmem:[#allocation14 + $0xf8] sm:$0xff] }
 0x2e3   : > { %v1078_v59 = vpop.f32.mrb[10].mxu1 }
 0x2e4   : > { %v1362_v60 = vmul.f32 0.2236068, %v1078_v59  ;;  %v2805_v61 = vpop.f32.mrb[11].mxu1  ;;  %v1806_v59 = vld [vmem:[#allocation14 + $0x88] sm:$0xff] }
 0x2e5   : > { %v1807_v61 = vld [vmem:[#allocation14 + $0x90] sm:$0xff] }
 0x2e6   : > { %v1368_v62 = vsel %vm1367_vm1, %v1362_v60, -inf }
 0x2e7   : > { %1369 = vmax.xlane.f32.xlu0 %v1368_v62  ;;  %v1148_v63 = vpop.f32.mrb[12].mxu1  ;;  %v1808_v62 = vld [vmem:[#allocation14 + $0x98] sm:$0xff] }
 0x2e8   : > { %v1363_v2 = vmul.f32 0.2236068, %v1148_v63  ;;  %v2810_v3 = vpop.f32.mrb[13].mxu1  ;;  %v3102_v63 = vpack.c.bf16 %v1808_v62, %v1807_v61  ;;  %v1962_v62 = vld [vmem:[#allocation14 + $0x100] sm:$0xff] }
 0x2e9   : > { %v1810_v3 = vld [vmem:[#allocation14 + $0xa8] sm:$0xff] }
 0x2ea   : > { %v1371_v4 = vsel %vm1367_vm1, %v1363_v2, -inf }
 0x2eb   : > { %1372 = vmax.xlane.f32.xlu0 %v1371_v4  ;;  %v1218_v5 = vpop.f32.mrb[14].mxu1 }
 0x2ec   : > { %v1364_v6 = vmul.f32 0.2236068, %v1218_v5  ;;  %v2815_v7 = vpop.f32.mrb[15].mxu1  ;;  %v1811_v5 = vld [vmem:[#allocation14 + $0xb0] sm:$0xff] }
 0x2ee   : > { %v1374_v8 = vsel %vm1367_vm1, %v1364_v6, -inf }
 0x2ef   : > { %1375 = vmax.xlane.f32.xlu1 %v1374_v8  ;;  %v1288_v9 = vpop.f32.mrb[16].mxu1  ;;  %v1813_v8 = vld [vmem:[#allocation14 + $0xc0] sm:$0xff] }
 0x2f0   : > { %v1365_v10 = vmul.f32 0.2236068, %v1288_v9  ;;  %v2820_v11 = vpop.f32.mrb[17].mxu1  ;;  %v1814_v9 = vld [vmem:[#allocation14 + $0xc8] sm:$0xff] }
 0x2f1   : > { %v1815_v11 = vld [vmem:[#allocation14 + $0xd0] sm:$0xff] }
 0x2f2   : > { %v1377_v12 = vsel %vm1367_vm1, %v1365_v10, -inf }
 0x2f3   : > { %1378 = vmax.xlane.f32.xlu1 %v1377_v12  ;;  %v1358_v13 = vpop.f32.mrb[18].mxu1  ;;  %v1816_v12 = vld [vmem:[#allocation14 + $0xd8] sm:$0xff] }
 0x2f4   : > { %v1366_v14 = vmul.f32 0.2236068, %v1358_v13  ;;  %v2825_v15 = vpop.f32.mrb[19].mxu1  ;;  %v3114_v13 = vpack.c.bf16 %v1816_v12, %v1815_v11  ;;  %v2055_v11 = vld [vmem:[#allocation14 + $0x1a8] sm:$0xff] }
 0x2f5   : > { %v1818_v15 = vld [vmem:[#allocation14 + $0xe8] sm:$0xff] }
 0x2f6   : > { %v1380_v16 = vsel %vm1367_vm1, %v1366_v14, -inf }
 0x2f7   : > { %1381 = vmax.xlane.f32.xlu0 %v1380_v16 }
 0x374   : > { %v1370_v17 = vpop.xlane.xlu0 %1369 }
 0x375   : > { %v1383_v18 = vsub.f32 %v1362_v60, %v1370_v17  ;;  %v3099_v60 = vpack.c.bf16 %v1806_v59, %v1805_v58  ;;  %v2050_v59 = vld [vmem:[#allocation14 + $0x180] sm:$0xff] }
 0x377   : > { %v1388_v19 = vmul.f32 1.442695, %v1383_v18  ;;  %3100 = vmatpush3.bf16.msra.mxu0 %v3099_v60  ;;  %v2051_v60 = vld [vmem:[#allocation14 + $0x188] sm:$0xff] }
 0x378   : > { %v1373_v20 = vpop.xlane.xlu0 %1372  ;;  %3101 = vmatprep.subr.bf16.mxu0 %v3684_v0  ;;  %v3171_v61 = vpack.c.bf16 %v2051_v60, %v2050_v59  ;;  %v2141_v59 = vld [vmem:[#allocation14 + $0x218] sm:$0xff] }
 0x379   : > { %3332 = vpow2.f32 %v1388_v19  ;;  %v1384_v21 = vsub.f32 %v1363_v2, %v1373_v20  ;;  %v1809_v2 = vld [vmem:[#allocation14 + $0xa0] sm:$0xff] }
 0x37a   : > { %v3105_v4 = vpack.c.bf16 %v1810_v3, %v1809_v2  ;;  %v2052_v2 = vld [vmem:[#allocation14 + $0x190] sm:$0xff]  ;;  %v2053_v3 = vld [vmem:[#allocation14 + $0x198] sm:$0xff] }
 0x37b   : > { %v1390_v22 = vmul.f32 1.442695, %v1384_v21  ;;  %3103 = vmatpush3.bf16.msra.mxu0 %v3102_v63  ;;  %v1963_v63 = vld [vmem:[#allocation14 + $0x108] sm:$0xff] }
 0x37c   : > { %v1376_v23 = vpop.xlane.xlu1 %1375  ;;  %3104 = vmatprep.subr.bf16.mxu0 %v3684_v0 }
 0x37d   : > { %3334 = vpow2.f32 %v1390_v22  ;;  %v1385_v24 = vsub.f32 %v1364_v6, %v1376_v23  ;;  %v1812_v6 = vld [vmem:[#allocation14 + $0xb8] sm:$0xff] }
 0x37e   : > { %v3108_v7 = vpack.c.bf16 %v1812_v6, %v1811_v5  ;;  %v3147_v6 = vpack.c.bf16 %v1963_v63, %v1962_v62  ;;  %v2143_v62 = vld [vmem:[#allocation14 + $0x228] sm:$0xff] }
 0x37f   : > { %v1392_v25 = vmul.f32 1.442695, %v1385_v24  ;;  %3106 = vmatpush3.bf16.msra.mxu0 %v3105_v4 }
 0x380   : > { %v1379_v26 = vpop.xlane.xlu1 %1378  ;;  %3107 = vmatprep.subr.bf16.mxu0 %v3684_v0 }
 0x381   : > { %3336 = vpow2.f32 %v1392_v25  ;;  %v1386_v27 = vsub.f32 %v1365_v10, %v1379_v26  ;;  %v3111_v10 = vpack.c.bf16 %v1814_v9, %v1813_v8  ;;  %v1964_v8 = vld [vmem:[#allocation14 + $0x110] sm:$0xff]  ;;  %v1965_v9 = vld [vmem:[#allocation14 + $0x118] sm:$0xff] }
 0x383   : > { %v4240_v28 = vpop.eup %3332  ;;  %v1394_v29 = vmul.f32 1.442695, %v1386_v27  ;;  %3109 = vmatpush3.bf16.msra.mxu0 %v3108_v7  ;;  %v3174_v7 = vpack.c.bf16 %v2053_v3, %v2052_v2  ;;  %v2144_v2 = vld [vmem:[#allocation14 + $0x230] sm:$0xff]  ;;  %v2145_v3 = vld [vmem:[#allocation14 + $0x238] sm:$0xff] }
 0x384   : > { %v1382_v30 = vpop.xlane.xlu0 %1381  ;;  %v1398_v31 = vsel %vm1367_vm1, %v4240_v28, 0.0  ;;  %3110 = vmatprep.subr.bf16.mxu0 %v3684_v0 }
 0x385   : > { %3338 = vpow2.f32 %v1394_v29  ;;  %v1387_v32 = vsub.f32 %v1366_v14, %v1382_v30  ;;  %1399 = vadd.xlane.f32.xlu1 %v1398_v31  ;;  %v1817_v14 = vld [vmem:[#allocation14 + $0xe0] sm:$0xff]  ;;  %v1789_v31 = vld [vmem:[#allocation14 + $0x8] sm:$0xff] }
 0x386   : > { %v3117_v16 = vpack.c.bf16 %v1818_v15, %v1817_v14  ;;  %v1788_v30 = vld [vmem:[#allocation14] sm:$0xff]  ;;  %v3150_v14 = vpack.c.bf16 %v1965_v9, %v1964_v8  ;;  %v2148_v8 = vld [vmem:[#allocation14 + $0x250] sm:$0xff]  ;;  %v2149_v9 = vld [vmem:[#allocation14 + $0x258] sm:$0xff] }
 0x387   : > { %v4244_v33 = vpop.eup %3334  ;;  %v1396_v34 = vmul.f32 1.442695, %v1387_v32  ;;  %3112 = vmatpush3.bf16.msra.mxu0 %v3111_v10  ;;  %v2054_v10 = vld [vmem:[#allocation14 + $0x1a0] sm:$0xff] }
 0x388   : > { %v1401_v35 = vsel %vm1367_vm1, %v4244_v33, 0.0  ;;  %3113 = vmatprep.subr.bf16.mxu0 %v3684_v0  ;;  %v3177_v15 = vpack.c.bf16 %v2055_v11, %v2054_v10  ;;  %v3210_v10 = vpack.c.bf16 %v2149_v9, %v2148_v8  ;;  %v2150_v11 = vld [vmem:[#allocation14 + $0x260] sm:$0xff] }
 0x389   : > { %3340 = vpow2.f32 %v1396_v34  ;;  %1402 = vadd.xlane.f32.xlu0 %v1401_v35  ;;  %v1790_v35 = vld [vmem:[#allocation14 + $0x10] sm:$0xff] }
 0x38b   : > { %v4248_v36 = vpop.eup %3336  ;;  %3115 = vmatpush3.bf16.msra.mxu0 %v3114_v13 }
 0x38c   : > { %v1404_v37 = vsel %vm1367_vm1, %v4248_v36, 0.0  ;;  %3116 = vmatprep.subr.bf16.mxu0 %v3684_v0 }
 0x38d   : > { %1405 = vadd.xlane.f32.xlu1 %v1404_v37 }
 0x38f   : > { %v4252_v38 = vpop.eup %3338  ;;  %3118 = vmatpush3.bf16.msra.mxu0 %v3117_v16  ;;  %v1966_v16 = vld [vmem:[#allocation14 + $0x120] sm:$0xff] }
 0x390   : > { %v1407_v39 = vsel %vm1367_vm1, %v4252_v38, 0.0  ;;  %3119 = vmatprep.subr.bf16.mxu0 %v3684_v0 }
 0x391   : > { %1408 = vadd.xlane.f32.xlu0 %v1407_v39  ;;  %v1793_v39 = vld [vmem:[#allocation14 + $0x28] sm:$0xff] }
 0x393   : > { %v4256_v40 = vpop.eup %3340 }
 0x394   : > { %v1410_v41 = vsel %vm1367_vm1, %v4256_v40, 0.0 }
 0x395   : > { %1411 = vadd.xlane.f32.xlu1 %v1410_v41 }
 0x412   : > { %v1400_v17 = vpop.xlane.xlu1 %1399 }
 0x413   : > { %3342 = vrcp.f32 %v1400_v17  ;;  %v1967_v17 = vld [vmem:[#allocation14 + $0x128] sm:$0xff] }
 0x416   : > { %v1403_v18 = vpop.xlane.xlu0 %1402 }
 0x417   : > { %3344 = vrcp.f32 %v1403_v18  ;;  %v2056_v18 = vld [vmem:[#allocation14 + $0x1b0] sm:$0xff] }
 0x41a   : > { %v1406_v19 = vpop.xlane.xlu1 %1405 }
 0x41b   : > { %3346 = vrcp.f32 %v1406_v19  ;;  %v2057_v19 = vld [vmem:[#allocation14 + $0x1b8] sm:$0xff] }
 0x41d   : > { %v3343_v20 = vpop.eup %3342 }
 0x41e   : > { %v1418_v21 = vmul.f32 %v3343_v20, %v4240_v28  ;;  %v1409_v22 = vpop.xlane.xlu0 %1408 }
 0x41f   : > { %3348 = vrcp.f32 %v1409_v22  ;;  %v3153_v22 = vpack.c.bf16 %v1967_v17, %v1966_v16 }
 0x420   : > { %2829 = vmatmul.mubr.msk.f32.vlgmr.msra.gmra.mrb[20].mxu1 %vm1367_vm1, %v1418_v21 }
 0x421   : > { %v3345_v23 = vpop.eup %3344  ;;  %2832 = vmatpush3.msra.mxu1 %v994_v48  ;;  %2833 = vmatprep.mubr.msk.f32.mxu1 %vm3685_vm0, %v3686_v1  ;;  %v1799_v48 = vld [vmem:[#allocation14 + $0x58] sm:$0xff] }
 0x422   : > { %v1419_v24 = vmul.f32 %v3345_v23, %v4244_v33  ;;  %v1412_v25 = vpop.xlane.xlu1 %1411  ;;  %2836 = vmatprep.subr.mxu1 %v3686_v1  ;;  %v3123_v33 = vpack.c.bf16 %v1789_v31, %v1788_v30  ;;  %v3138_v49 = vpack.c.bf16 %v1799_v48, %v1798_v47  ;;  %v3180_v23 = vpack.c.bf16 %v2057_v19, %v2056_v18  ;;  %v1975_v47 = vld [vmem:[#allocation14 + $0x168] sm:$0xff]  ;;  %v2064_v48 = vld [vmem:[#allocation14 + $0x1f0] sm:$0xff] }
 0x423   : > { %3350 = vrcp.f32 %v1412_v25  ;;  %v1969_v25 = vld [vmem:[#allocation14 + $0x138] sm:$0xff] }
 0x424   : > { %2834 = vmatmul.mubr.msk.f32.vlgmr.msra.gmra.mrb[22].mxu1 %vm1367_vm1, %v1419_v24  ;;  %v1968_v24 = vld [vmem:[#allocation14 + $0x130] sm:$0xff] }
 0x425   : > { %v3347_v26 = vpop.eup %3346  ;;  %2837 = vmatpush3.msra.mxu1 %v999_v50  ;;  %2838 = vmatprep.mubr.msk.f32.mxu1 %vm3685_vm0, %v3686_v1  ;;  %v1800_v50 = vld [vmem:[#allocation14 + $0x60] sm:$0xff]  ;;  %v3156_v30 = vpack.c.bf16 %v1969_v25, %v1968_v24 }
 0x426   : > { %v1420_v27 = vmul.f32 %v3347_v26, %v4248_v36  ;;  %2841 = vmatprep.subr.mxu1 %v3686_v1  ;;  %v1791_v36 = vld [vmem:[#allocation14 + $0x18] sm:$0xff]  ;;  %v3141_v52 = vpack.c.bf16 %v1801_v51, %v1800_v50  ;;  %v2058_v26 = vld [vmem:[#allocation14 + $0x1c0] sm:$0xff] }
 0x427   : > { %v3126_v37 = vpack.c.bf16 %v1791_v36, %v1790_v35  ;;  %v2061_v35 = vld [vmem:[#allocation14 + $0x1d8] sm:$0xff] }
 0x428   : > { %2839 = vmatmul.mubr.msk.f32.vlgmr.msra.gmra.mrb[24].mxu1 %vm1367_vm1, %v1420_v27  ;;  %v2059_v27 = vld [vmem:[#allocation14 + $0x1c8] sm:$0xff] }
 0x429   : > { %v3349_v28 = vpop.eup %3348  ;;  %2842 = vmatpush3.msra.mxu1 %v4264_v53  ;;  %2843 = vmatprep.mubr.msk.f32.mxu1 %vm3685_vm0, %v3686_v1  ;;  %v1802_v53 = vld [vmem:[#allocation14 + $0x70] sm:$0xff]  ;;  %v3183_v31 = vpack.c.bf16 %v2059_v27, %v2058_v26 }
 0x42a   : > { %v1421_v29 = vmul.f32 %v3349_v28, %v4252_v38  ;;  %2846 = vmatprep.subr.mxu1 %v3686_v1  ;;  %v1792_v38 = vld [vmem:[#allocation14 + $0x20] sm:$0xff]  ;;  %v3144_v55 = vpack.c.bf16 %v1803_v54, %v1802_v53  ;;  %v1977_v53 = vld [vmem:[#allocation14 + $0x178] sm:$0xff] }
 0x42b   : > { %v3129_v41 = vpack.c.bf16 %v1793_v39, %v1792_v38 }
 0x42c   : > { %2844 = vmatmul.mubr.msk.f32.vlgmr.msra.gmra.mrb[26].mxu1 %vm1367_vm1, %v1421_v29 }
 0x42d   : > { %v3351_v32 = vpop.eup %3350  ;;  %2847 = vmatpush3.msra.mxu1 %v4266_v56  ;;  %2848 = vmatprep.mubr.msk.f32.mxu1 %vm3685_vm0, %v3686_v1  ;;  %v1819_v56 = vld [vmem:[#allocation14 + $0xf0] sm:$0xff] }
 0x42e   : > { %v1422_v34 = vmul.f32 %v3351_v32, %v4256_v40  ;;  %3122 = vmatprep.subr.bf16.mxu1 %v3684_v0  ;;  %v1794_v40 = vld [vmem:[#allocation14 + $0x30] sm:$0xff]  ;;  %v3120_v58 = vpack.c.bf16 %v1820_v57, %v1819_v56  ;;  %v1970_v32 = vld [vmem:[#allocation14 + $0x140] sm:$0xff]  ;;  %v2139_v56 = vld [vmem:[#allocation14 + $0x208] sm:$0xff] }
 0x42f   : > { %v3132_v43 = vpack.c.bf16 %v1795_v42, %v1794_v40  ;;  %v1973_v40 = vld [vmem:[#allocation14 + $0x158] sm:$0xff]  ;;  %v2062_v42 = vld [vmem:[#allocation14 + $0x1e0] sm:$0xff] }
 0x430   : > { %2849 = vmatmul.mubr.msk.f32.vlgmr.msra.gmra.mrb[28].mxu1 %vm1367_vm1, %v1422_v34  ;;  %3121 = vmatpush3.bf16.msra.mxu0 %v3120_v58  ;;  %v2060_v34 = vld [vmem:[#allocation14 + $0x1d0] sm:$0xff] }
 0x431   : > { %3124 = vmatpush3.bf16.msra.mxu1 %v3123_v33  ;;  %2918 = vmatprep.mubr.msk.f32.mxu1 %vm3685_vm0, %v3686_v1  ;;  %v1971_v33 = vld [vmem:[#allocation14 + $0x148] sm:$0xff]  ;;  %v3186_v39 = vpack.c.bf16 %v2061_v35, %v2060_v34  ;;  %v2140_v58 = vld [vmem:[#allocation14 + $0x210] sm:$0xff]  ;;  %v2235_v34 = vlaneseq }
 0x432   : > { %3125 = vmatprep.subr.bf16.mxu1 %v3684_v0  ;;  %3146 = vmatprep.subr.bf16.mxu0 %v3684_v0  ;;  %v3159_v38 = vpack.c.bf16 %v1971_v33, %v1970_v32  ;;  %v3198_v60 = vpack.c.bf16 %v2141_v59, %v2140_v58 }
 0x433   : > { %v2236_v35 = vand.u32 127, %v2235_v34 }
 0x435   : > { %3127 = vmatpush3.bf16.msra.mxu1 %v3126_v37  ;;  %vm2237_vm2 = vcmp.lt.s32.totalorder %v2236_v35, 100 }
 0x436   : > { %3128 = vmatprep.subr.bf16.mxu1 %v3684_v0 }
 0x439   : > { %3130 = vmatpush3.bf16.msra.mxu1 %v3129_v41  ;;  %v1972_v41 = vld [vmem:[#allocation14 + $0x150] sm:$0xff] }
 0x43a   : > { %3131 = vmatprep.subr.bf16.mxu1 %v3684_v0  ;;  %v3162_v44 = vpack.c.bf16 %v1973_v40, %v1972_v41 }
 0x43d   : > { %3133 = vmatpush3.bf16.msra.mxu1 %v3132_v43  ;;  %v2063_v43 = vld [vmem:[#allocation14 + $0x1e8] sm:$0xff] }
 0x43e   : > { %3134 = vmatprep.subr.bf16.mxu1 %v3684_v0  ;;  %v3189_v45 = vpack.c.bf16 %v2063_v43, %v2062_v42 }
 0x441   : > { %3136 = vmatpush3.bf16.msra.mxu1 %v3135_v46  ;;  %v1974_v46 = vld [vmem:[#allocation14 + $0x160] sm:$0xff] }
 0x442   : > { %3137 = vmatprep.subr.bf16.mxu1 %v3684_v0  ;;  %v3165_v50 = vpack.c.bf16 %v1975_v47, %v1974_v46  ;;  %v2486_v46 = vld [vmem:[%s4499_s7] ss:$0 sm:$0xff] }
 0x445   : > { %3139 = vmatpush3.bf16.msra.mxu1 %v3138_v49  ;;  %v2065_v49 = vld [vmem:[#allocation14 + $0x1f8] sm:$0xff] }
 0x446   : > { %3140 = vmatprep.subr.bf16.mxu1 %v3684_v0  ;;  %v3192_v51 = vpack.c.bf16 %v2065_v49, %v2064_v48 }
 0x449   : > { %3142 = vmatpush3.bf16.msra.mxu1 %v3141_v52  ;;  %v1976_v52 = vld [vmem:[#allocation14 + $0x170] sm:$0xff] }
 0x44a   : > { %3143 = vmatprep.subr.bf16.mxu1 %v3684_v0  ;;  %v3168_v54 = vpack.c.bf16 %v1977_v53, %v1976_v52 }
 0x44d   : > { %3145 = vmatpush3.bf16.msra.mxu1 %v3144_v55  ;;  %v2138_v55 = vld [vmem:[#allocation14 + $0x200] sm:$0xff] }
 0x44e   : > { %3170 = vmatprep.subr.bf16.mxu1 %v3684_v0  ;;  %v3195_v57 = vpack.c.bf16 %v2139_v56, %v2138_v55 }
 0x4f3   : > { %v1492_v4 = vpop.f32.mrb[20].mxu1 }
 0x4f4   : > { %v2830_v5 = vpop.f32.mrb[21].mxu1  ;;  %2919 = vmatmul.mubr.f32.vlgmr.msra.gmra.mrb[30].mxu1 %v1492_v4  ;;  %v3204_v4 = vpack.c.bf16 %v2145_v3, %v2144_v2 }
 0x4f5   : > { %3172 = vmatpush3.bf16.msra.mxu1 %v3171_v61  ;;  %2988 = vmatprep.mubr.msk.f32.mxu1 %vm3685_vm0, %v3686_v1  ;;  %v2142_v61 = vld [vmem:[#allocation14 + $0x220] sm:$0xff] }
 0x4f6   : > { %3173 = vmatprep.subr.bf16.mxu1 %v3684_v0  ;;  %v3201_v63 = vpack.c.bf16 %v2143_v62, %v2142_v61  ;;  %v2146_v5 = vld [vmem:[#allocation14 + $0x240] sm:$0xff] }
 0x4f7   : > { %v1565_v12 = vpop.f32.mrb[22].mxu1 }
 0x4f8   : > { %v2835_v13 = vpop.f32.mrb[23].mxu1  ;;  %2884 = vmatmul.mubr.f32.vlgmr.msra.gmra.mrb[20].mxu0 %v1565_v12  ;;  %v2151_v12 = vld [vmem:[#allocation14 + $0x268] sm:$0xff] }
 0x4f9   : > { %3148 = vmatpush3.bf16.msra.mxu0 %v3147_v6  ;;  %3175 = vmatpush3.bf16.msra.mxu1 %v3174_v7  ;;  %v2147_v6 = vld [vmem:[#allocation14 + $0x248] sm:$0xff]  ;;  %v3213_v13 = vpack.c.bf16 %v2151_v12, %v2150_v11 }
 0x4fa   : > { %3149 = vmatprep.subr.bf16.mxu0 %v3684_v0  ;;  %3176 = vmatprep.subr.bf16.mxu1 %v3684_v0  ;;  %v3207_v7 = vpack.c.bf16 %v2147_v6, %v2146_v5 }
 0x4fb   : > { %v4315_v20 = vpop.f32.mrb[24].mxu1  ;;  %2953 = vmatprep.mubr.msk.f32.mxu0 %vm3685_vm0, %v3686_v1 }
 0x4fc   : > { %v2840_v21 = vpop.f32.mrb[25].mxu1 }
 0x4fd   : > { %3151 = vmatpush3.bf16.msra.mxu0 %v3150_v14  ;;  %3178 = vmatpush3.bf16.msra.mxu1 %v3177_v15  ;;  %v2152_v14 = vld [vmem:[#allocation14 + $0x270] sm:$0xff]  ;;  %v2153_v15 = vld [vmem:[#allocation14 + $0x278] sm:$0xff] }
 0x4fe   : > { %3152 = vmatprep.subr.bf16.mxu0 %v3684_v0  ;;  %3179 = vmatprep.subr.bf16.mxu1 %v3684_v0  ;;  %v3216_v16 = vpack.c.bf16 %v2153_v15, %v2152_v14 }
 0x4ff   : > { %v1711_v28 = vpop.f32.mrb[26].mxu1 }
 0x500   : > { %v2845_v29 = vpop.f32.mrb[27].mxu1 }
 0x501   : > { %3154 = vmatpush3.bf16.msra.mxu0 %v3153_v22  ;;  %3181 = vmatpush3.bf16.msra.mxu1 %v3180_v23 }
 0x502   : > { %3155 = vmatprep.subr.bf16.mxu0 %v3684_v0  ;;  %3182 = vmatprep.subr.bf16.mxu1 %v3684_v0 }
 0x503   : > { %v4323_v36 = vpop.f32.mrb[28].mxu1 }
 0x504   : > { %v2850_v37 = vpop.f32.mrb[29].mxu1 }
 0x505   : > { %3157 = vmatpush3.bf16.msra.mxu0 %v3156_v30  ;;  %3184 = vmatpush3.bf16.msra.mxu1 %v3183_v31  ;;  %v2233_v31 = vld [vmem:[%s4121_s20] sm:$0xff]  ;;  %s657_s20 = scalar_lea.vmem [#allocation16], %s2470_s18  ;;  %s3590_s18 = sshll.u32 %s3687_s9, 4  ;;  %s3591_s18 = int_to_ptr.vmem [resolvable:$false] %s3590_s18 }
 0x506   : > { %3158 = vmatprep.subr.bf16.mxu0 %v3684_v0  ;;  %3185 = vmatprep.subr.bf16.mxu1 %v3684_v0  ;;  %s2283_s19 = sshll.u32 %s657_s20, 4  ;;  %s3592_s13 = scalar_lea.vmem %s3591_s18, 256  ;;  %s4363_s19 = int_to_ptr.vmem [resolvable:$true] %s2283_s19 }
 0x507   : > { %s3586_s12 = scalar_lea.vmem %s4363_s19, 128  ;;  %p3593_p3 = scmp.lt.s32.totalorder %s4363_s19, %s3591_s18 }
 0x508   : > { %p3587_p9 = scmp.ne.s32.totalorder %s4363_s19, %s3586_s12  ;;  %p3594_p5 = scmp.lt.s32.totalorder %s3592_s13, %s3586_s12 }
 0x509   : > { %3160 = vmatpush3.bf16.msra.mxu0 %v3159_v38  ;;  %3187 = vmatpush3.bf16.msra.mxu1 %v3186_v39  ;;  %v2485_v38 = vsel %vm2237_vm2, 1.0, %v3686_v1 }
 0x50a   : > { %3161 = vmatprep.subr.bf16.mxu0 %v3684_v0  ;;  %3188 = vmatprep.subr.bf16.mxu1 %v3684_v0  ;;  %p3588_p10 = pnand %p3587_p9, %p4502_p12  ;;  %p3595_p6 = por %p3594_p5, %p3593_p3 }
 0x50c   : > { %p3589_p1 = pneg %p3588_p10 }
 0x50d   : > { %3163 = vmatpush3.bf16.msra.mxu0 %v3162_v44  ;;  %3190 = vmatpush3.bf16.msra.mxu1 %v3189_v45 }
 0x50e   : > { %3164 = vmatprep.subr.bf16.mxu0 %v3684_v0  ;;  %3191 = vmatprep.subr.bf16.mxu1 %v3684_v0  ;;  %p3596_p8 = pnand %p3595_p6, %p3589_p1 }
 0x511   : > { %3166 = vmatpush3.bf16.msra.mxu0 %v3165_v50  ;;  %3193 = vmatpush3.bf16.msra.mxu1 %v3192_v51 }
 0x512   : > { %3167 = vmatprep.subr.bf16.mxu0 %v3684_v0 }
 0x514   : > { %2989 = vmatmul.mubr.f32.vlgmr.msra.gmra.mrb[32].mxu1 %v1711_v28 }
 0x515   : > { %3169 = vmatpush3.bf16.msra.mxu0 %v3168_v54 }
 0x516   : > { %3194 = vmatprep.subr.bf16.mxu0 %v3684_v0 }
 0x518   : > { %2954 = vmatmul.mubr.f32.vlgmr.msra.gmra.mrb[22].mxu0 %v4315_v20 }
 0x519   : > { %3196 = vmatpush3.bf16.msra.mxu0 %v3195_v57  ;;  %3023 = vmatprep.mubr.msk.f32.mxu0 %vm3685_vm0, %v3686_v1  ;;  %v2487_v1 = vld [vmem:[%s4500_s4] ss:$0 sm:$0xff] }
 0x51a   : > { %3197 = vmatprep.subr.bf16.mxu0 %v3684_v0 }
 0x51d   : > { %3199 = vmatpush3.bf16.msra.mxu0 %v3198_v60 }
 0x51e   : > { %3200 = vmatprep.subr.bf16.mxu0 %v3684_v0 }
 0x521   : > { %3202 = vmatpush3.bf16.msra.mxu0 %v3201_v63 }
 0x522   : > { %3203 = vmatprep.subr.bf16.mxu0 %v3684_v0 }
 0x525   : > { %3205 = vmatpush3.bf16.msra.mxu0 %v3204_v4 }
 0x526   : > { %3206 = vmatprep.subr.bf16.mxu0 %v3684_v0 }
 0x529   : > { %3208 = vmatpush3.bf16.msra.mxu0 %v3207_v7 }
 0x52a   : > { %3209 = vmatprep.subr.bf16.mxu0 %v3684_v0 }
 0x52d   : > { %3211 = vmatpush3.bf16.msra.mxu0 %v3210_v10 }
 0x52e   : > { %3212 = vmatprep.subr.bf16.mxu0 %v3684_v0 }
 0x531   : > { %3214 = vmatpush3.bf16.msra.mxu0 %v3213_v13 }
 0x532   : > { %3215 = vmatprep.subr.bf16.mxu0 %v3684_v0  ;;  %v2484_v0 = vld [vmem:[%s4497_s1] ss:$0 sm:$0xff] }
 0x535   : > { %3217 = vmatpush3.bf16.msra.mxu0 %v3216_v16 }
 0x538   : > { %3024 = vmatmul.mubr.f32.vlgmr.msra.gmra.mrb[24].mxu0 %v4323_v36 }
 0x5c7   : > { %v1957_v17 = vpop.f32.mrb[30].mxu1 }
 0x5c8   : > { %v2920_v18 = vpop.f32.mrb[31].mxu1 }
 0x5cb   : > { %v1887_v19 = vpop.f32.mrb[20].mxu0 }
 0x5cc   : > { %v1958_v20 = vadd.f32 %v1957_v17, %v1887_v19  ;;  %v2885_v21 = vpop.f32.mrb[21].mxu0 }
 0x5e7   : > { %v2132_v22 = vpop.f32.mrb[32].mxu1 }
 0x5e8   : > { %v2990_v23 = vpop.f32.mrb[33].mxu1 }
 0x5eb   : > { %v2044_v24 = vpop.f32.mrb[22].mxu0 }
 0x5ec   : > { %v2048_v25 = vadd.f32 %v2044_v24, %v1958_v20  ;;  %v2955_v26 = vpop.f32.mrb[23].mxu0 }
 0x5ee   : > { %v2136_v27 = vadd.f32 %v2132_v22, %v2048_v25 }
 0x60b   : > { %v2220_v28 = vpop.f32.mrb[24].mxu0 }
 0x60c   : > { %v2224_v29 = vadd.f32 %v2220_v28, %v2136_v27  ;;  %v3025_v30 = vpop.f32.mrb[25].mxu0 }
 0x60e   : > { %v2232_v32 = vadd.f32 %v2484_v0, %v2224_v29 }
 0x610   : > { %v2234_v33 = vadd.f32 %v2233_v31, %v2232_v32 }
 0x612   : > { %2240 = vadd.xlane.f32.xlu0 %v2234_v33 }
 0x69f   : > { %v2241_v36 = vpop.xlane.xlu0 %2240 }
 0x6a0   : > { %v2242_v37 = vmul.f32 0.01, %v2241_v36 }
 0x6a2   : > { %v2243_v39 = vsub.f32 %v2234_v33, %v2242_v37 }
 0x6a4   : > { %v2244_v41 = vmul.f32 %v2485_v38, %v2243_v39 }
 0x6a6   : > { %v2245_v40 = vmul.f32 %v2244_v41, %v2244_v41 }
 0x6a8   : > { %2246 = vadd.xlane.f32.xlu1 %v2245_v40 }
 0x735   : > { %v2247_v42 = vpop.xlane.xlu1 %2246 }
 0x736   : > { %v2248_v43 = vmul.f32 0.01, %v2247_v42 }
 0x738   : > { %v2249_v44 = vadd.f32 1e-05, %v2248_v43 }
 0x73a   : > { %3352 = vrsqrt.f32 %v2249_v44 }
 0x744   : > { %v3353_v45 = vpop.eup %3352 }
 0x745   : > { %v2251_v47 = vmul.f32 %v3353_v45, %v2244_v41 }
 0x747   : > { %v2259_v48 = vmul.f32 %v2486_v46, %v2251_v47 }
 0x749   : > { %v2267_v49 = vadd.f32 %v2487_v1, %v2259_v48 }
 0x74b   : > { %2268 = vst [vmem:[%s657_s20] sm:$0xff] %v2267_v49 }
 0x74c   : > { %3599 = shalt.err (!%p3596_p8)
}
 0x74d   : > { %s3600_s11 = scalar_lea.hbm %s4361_s25, 128  ;;  %s3604_s17 = scalar_lea.hbm %s4501_s22, 256 }
 0x74e   : > { %p3601_p11 = scmp.ne.s32.totalorder %s4361_s25, %s3600_s11  ;;  %p3605_p4 = scmp.lt.u32.totalorder %s4361_s25, %s4501_s22 }
 0x74f   : > { %p3606_p13 = scmp.lt.u32.totalorder %s3604_s17, %s3600_s11  ;;  %p3608_p9 = scmp.lt.u32.totalorder %s3600_s11, %s4361_s25 }
 0x750   : > { %p3602_p2 = pnand %p3601_p11, %p4502_p12 }
 0x751   : > { %p3607_p7 = por %p3606_p13, %p3605_p4 }
 0x752   : > { %p3603_p0 = pneg %p3602_p2 }
 0x753   : > { %p3609_p10 = por %p3608_p9, %p3607_p7 }
 0x755   : > { %p3610_p1 = pnand %p3609_p10, %p3603_p0 }
 0x757   : > { %3613 = shalt.err (!%p3610_p1)
}
 0x758   : > { %3249 = dma.vmem_to_hbm [thread:$0]  (%p4502_p12), %s4363_s19, 128, %s4361_s25, %s2270_s15  }
 0x759 PF: > { %s4503_s24 = sld [smem:[#allocation24_spill]]  ;;  %s4504_s7 = sld [smem:[#allocation27_spill]] }
 0x75a   : > { %p4506_p5 = scmp.ge.s32.totalorder %s3672_s16, 2 }
 0x75f   : > { %s2295_s21 = sand.u32 1, %s4503_s24   ;;  %p4505_p3 = scmp.ne.s32.totalorder %s4504_s7, 0 }
 0x760   : > { %s2296_s28 = scalar_lea.sflag [#allocation4], %s2295_s21 }
 0x761   : > { %p3278_p6 = pnand %p4506_p5, %p4505_p3 }
 0x763   : > { %3655 = dma.done.wait (!%p3278_p6), %s2296_s28, 128  }
 0x764   : > { %3657 = vsyncadd (!%p3278_p6), %s2296_s28, 4294967168  ;;  %s4507_s16 = sld [smem:[#allocation28_spill]]  ;;  %s4508_s4 = sld [smem:[#allocation25_spill]] }
 0x765   : > { %s4509_s15 = sld [smem:[#allocation30_spill]]  ;;  %s4510_s29 = smov %s3664_s30 }
 0x76a   : > { %p35_p8 = scmp.ge.s32.totalorder %s4507_s16, 4   ;;  %s4511_s30 = smov %s4508_s4 }
 0x76c   :  { %37 = sbr.rel (!%p35_p8) target bundleno = 22 (0x16), region = 178 }
 0x773   :  { %2301 = vsyncpa [#allocation3], 1 }
 0x774   :  { %2303 = vsyncpa [#allocation3 + $0x1], 1 }
 0x775   :  { %2304 = vsyncpa [#allocation6], 1 }
 0x776   :  { %2306 = vsyncpa [#allocation6 + $0x1], 1 }
 0x777   :  { %2307 = vsyncpa [#allocation9], 1 }
 0x778   :  { %2309 = vsyncpa [#allocation9 + $0x1], 1 }
 0x779   :  { %2310 = vsyncpa [#allocation12], 1 }
 0x77a   :  { %2311 = vsyncpa [#allocation15], 1 }
 0x77b   :  { %2312 = vsyncpa [#allocation4], 1 }
 0x77c   :  { %2314 = vsyncpa [#allocation4 + $0x1], 1 }

</bundles_post_ra>
